<compile_context>
chip_gen: v7x
topology: tpu7x:2x2x1
jax: 0.10.0
libtpu: 0.0.40
codegen_flags: <defaults>
</compile_context>

<pallas_src>
import functools

import numpy as np
import jax
import jax.numpy as jnp
from jax import lax
from jax.experimental import pallas as pl
from jax.experimental.pallas import tpu as pltpu


# -----------------------------------------------------------------------------
# Pallas kernel: full forward pass for ONE graph (grid axis = batch of graphs)
# -----------------------------------------------------------------------------
def knot_graph_kernel(
    # per-graph tensors (leading batch dim squeezed by the BlockSpecs)
    node_cnt_ref,    # [N, L1]     per-node count of each strand label
    edge_cat_ref,    # [E, L1+3]   concat(one-hot strand label, one-hot crossing sign)
    src_oh_ref,      # [E, N]      one-hot of edge source (gather == matmul)
    mask_blk_ref,    # [H*N, H*E]  kron(I_H, dst one-hot): block-diag softmax mask
    node_mask_ref,   # [N, 1]      1.0 for real nodes
    # weights (grid-invariant, VMEM resident)
    w_strand_ref,    # [L1, D]
    pos_sum_ref,     # [1, D]      sum_p pos_emb[p]
    w_qkvs_ref,      # [L, D, 4D]  concat(Wq, Wk, Wv, Wskip)
    b_qkvs_ref,      # [L, 1, 4D]
    we2_ref,         # [L, L1+3, 2D]  folded edge encoder, duplicated for k|v halves
    be2_ref,         # [L, 1, 2D]
    ln_g_ref,        # [L-1, 1, D]
    ln_b_ref,        # [L-1, 1, D]
    wp_ref, bp_ref, wv1_ref, bv1_ref, wv2_ref, bv2_ref,
    # outputs
    policy_ref,      # [N, 2]
    value_ref,       # [1, 1]
    # scratch
    agg_ref,         # VMEM [N, D]  per-layer attention output accumulator
    *, num_layers, num_heads,
):
    f32 = jnp.float32
    D = w_qkvs_ref.shape[1]
    H = num_heads
    C = D // H
    N = node_cnt_ref.shape[0]
    scale = 1.0 / float(np.sqrt(C))

    # ---- node features: sum_p (strand_emb[id_p] + pos_emb[p]) ----------------
    x = jnp.dot(node_cnt_ref[...], w_strand_ref[...],
                preferred_element_type=f32) + pos_sum_ref[...]               # [N, D]

    edge_cat = edge_cat_ref[...]                                             # [E, L1+3]
    src_oh = src_oh_ref[...]                                                 # [E, N]
    # Block-diagonal (per-head) destination mask. Padded edges / wrong-head blocks are
    # zero here, which is the only thing keeping padded-edge e_emb (== folded bias)
    # out of the aggregation. Keep any future use of k_e/v_e behind this mask.
    mask_blk = mask_blk_ref[...] > 0.0                                       # [H*N, H*E]

    for li in range(num_layers):
        # -- fused q|k|v|skip projection (one [D,4D] matmul, one bias add) ----
        xp = jnp.dot(x, w_qkvs_ref[li], preferred_element_type=f32) + b_qkvs_ref[li]
        q = xp[:, :D]                                                        # [N, D]
        kv = xp[:, D:3 * D]                                                  # [N, 2D]
        skip = xp[:, 3 * D:]                                                 # [N, D]

        # -- folded edge embedding (one matmul) + fused k|v source gather -----
        e_emb2 = jnp.dot(edge_cat, we2_ref[li], preferred_element_type=f32) + be2_ref[li]
        kv_e = jnp.dot(src_oh, kv, preferred_element_type=f32) + e_emb2      # [E, 2D]

        # -- stack heads on the sublane axis: row h*N+n / h*E+e is head h -----
        q_stack = jnp.concatenate([q[:, h * C:(h + 1) * C] for h in range(H)], axis=0)
        k_stack = jnp.concatenate([kv_e[:, h * C:(h + 1) * C] for h in range(H)], axis=0)
        v_stack = jnp.concatenate(
            [kv_e[:, D + h * C:D + (h + 1) * C] for h in range(H)], axis=0)

        # -- single logits matmul for all heads, block-diag masked softmax ----
        logits = lax.dot_general(q_stack, k_stack, (((1,), (1,)), ((), ())),
                                 preferred_element_type=f32) * scale         # [H*N, H*E]
        masked = jnp.where(mask_blk, logits, -1e30)
        m = jnp.max(masked, axis=-1, keepdims=True)
        m = jnp.where(m < -1e29, 0.0, m)                # rows with no incoming edges
        p = jnp.where(mask_blk, jnp.exp(logits - m), 0.0)
        denom = jnp.sum(p, axis=-1, keepdims=True)
        inv = pl.reciprocal(jnp.where(denom > 0.0, denom, 1.0), approx=True)
        alpha = p * inv                                                      # [H*N, H*E]

        # -- single weighted-sum matmul; off-diagonal blocks of alpha are zero
        out_stack = jnp.dot(alpha, v_stack, preferred_element_type=f32)      # [H*N, C]

        # -- re-pack heads onto the lane axis via scratch writes (no concat) --
        for h in range(H):
            agg_ref[:, h * C:(h + 1) * C] = out_stack[h * N:(h + 1) * N, :]

        x_new = agg_ref[...] + skip                                          # [N, D]

        if li < num_layers - 1:
            mu = jnp.mean(x_new, axis=-1, keepdims=True)
            var = jnp.mean((x_new - mu) ** 2, axis=-1, keepdims=True)
            xn = (x_new - mu) * lax.rsqrt(var + 1e-5)
            x = jnp.maximum(xn * ln_g_ref[li] + ln_b_ref[li], 0.0)           # LN + ReLU
        else:
            x = x_new
        # TODO(synk): dropout path omitted (module default dropout=0.0)

    # ---- policy / value heads -------------------------------------------------
    policy_ref[...] = jnp.dot(x, wp_ref[...], preferred_element_type=f32) + bp_ref[...]

    mask = node_mask_ref[...]                                                # [N, 1]
    n_nodes = jnp.sum(mask, axis=0, keepdims=True)                           # [1, 1]
    graph_feat = jnp.sum(x * mask, axis=0, keepdims=True) / n_nodes          # [1, D]
    v1 = jnp.maximum(jnp.dot(graph_feat, wv1_ref[...], preferred_element_type=f32)
                     + bv1_ref[...], 0.0)
    value_ref[...] = jnp.tanh(jnp.dot(v1, wv2_ref[...], preferred_element_type=f32)
                              + bv2_ref[...])


# -----------------------------------------------------------------------------
# Wrapper: batched pallas_call (grid over graphs, parallel axis for v7x megacore)
# -----------------------------------------------------------------------------
def knot_graph_net_pallas(graph, packed, *, num_layers, num_heads, n_real):
    node_cnt = graph["node_cnt"]                                  # [B, N, L1]
    B, n_pad, _ = node_cnt.shape
    D = packed["w_qkvs"].shape[1]

    graph_args = (node_cnt, graph["edge_cat"], graph["src_oh"],
                  graph["mask_blk"], graph["node_mask"])
    weight_names = ("w_strand", "pos_sum", "w_qkvs", "b_qkvs", "we2", "be2",
                    "ln_g", "ln_b", "wp", "bp", "wv1", "bv1", "wv2", "bv2")
    weight_args = tuple(packed[k] for k in weight_names)

    # One graph per grid step; batch dim squeezed out of the kernel view.
    # TODO(synk): at large N/E replace the dense one-hot gather/mask with index-based
    # gather via PrefetchScalarGridSpec scalar prefetch (O(E*D) instead of O(N*E*D)).
    def graph_spec(a):
        return pl.BlockSpec((None,) + a.shape[1:],
                            lambda b, nd=a.ndim: (b,) + (0,) * (nd - 1))

    # Weights: full array, same block for every grid step -> stays VMEM resident.
    def weight_spec(a):
        return pl.BlockSpec(a.shape, lambda b, nd=a.ndim: (0,) * nd)

    kernel = functools.partial(knot_graph_kernel,
                               num_layers=num_layers, num_heads=num_heads)
    node_policy, value = pl.pallas_call(
        kernel,
        grid=(B,),
        out_shape=(jax.ShapeDtypeStruct((B, n_pad, 2), jnp.float32),
                   jax.ShapeDtypeStruct((B, 1, 1), jnp.float32)),
        in_specs=[graph_spec(a) for a in graph_args]
                 + [weight_spec(a) for a in weight_args],
        out_specs=(pl.BlockSpec((None, n_pad, 2), lambda b: (b, 0, 0)),
                   pl.BlockSpec((None, 1, 1), lambda b: (b, 0, 0))),
        scratch_shapes=[pltpu.VMEM((n_pad, D), jnp.float32)],
        compiler_params=pltpu.CompilerParams(
            dimension_semantics=("parallel",),
            vmem_limit_bytes=32 * 1024 * 1024),
    )(*graph_args, *weight_args)

    # per-graph node_policy.view(1, -1) of the PyTorch forward
    policy = node_policy[:, :n_real, :].reshape(B, -1)
    return policy, value.reshape(B, 1)


# -----------------------------------------------------------------------------
# Deterministic parameter init (shapes follow KnotGraphNet.__init__)
# -----------------------------------------------------------------------------
def init_params(key, *, max_label, hidden_dim, num_layers,
                edge_sign_dim=8, edge_out_dim=16):
    L1 = max_label + 1
    D = hidden_dim
    ks = iter(jax.random.split(key, 40))

    def nrm(shape, scale=0.1):
        return jax.random.normal(next(ks), shape, jnp.float32) * scale

    w_pos = nrm((4, D))
    return dict(
        w_strand=nrm((L1, D)),
        pos_sum=w_pos.sum(axis=0, keepdims=True),        # sum_p pos_emb[p]
        w_sign=nrm((3, edge_sign_dim)),
        w_el_s=nrm((D, edge_out_dim)),                   # edge_linear weight (strand part)
        w_el_g=nrm((edge_sign_dim, edge_out_dim)),       # edge_linear weight (sign part)
        b_el=nrm((1, edge_out_dim)),
        wq=nrm((num_layers, D, D)), bq=nrm((num_layers, 1, D)),
        wk=nrm((num_layers, D, D)), bk=nrm((num_layers, 1, D)),
        wv=nrm((num_layers, D, D)), bv=nrm((num_layers, 1, D)),
        we=nrm((num_layers, edge_out_dim, D)),           # lin_edge (no bias)
        wskip=nrm((num_layers, D, D)), bskip=nrm((num_layers, 1, D)),
        ln_g=jnp.ones((max(num_layers - 1, 1), 1, D), jnp.float32),
        ln_b=jnp.zeros((max(num_layers - 1, 1), 1, D), jnp.float32),
        wp=nrm((D, 2)), bp=nrm((1, 2)),
        wv1=nrm((D, D)), bv1=nrm((1, D)),
        wv2=nrm((D, 1)), bv2=nrm((1, 1)),
    )


# -----------------------------------------------------------------------------
# Wrapper-side weight fusion / constant folding (pure algebra, zero accuracy cost)
# -----------------------------------------------------------------------------
def pack_params(params):
    # fused per-layer projection [Wq | Wk | Wv | Wskip] and fused bias
    w_qkvs = jnp.concatenate(
        [params["wq"], params["wk"], params["wv"], params["wskip"]], axis=-1)
    b_qkvs = jnp.concatenate(
        [params["bq"], params["bk"], params["bv"], params["bskip"]], axis=-1)
    # constant-folded edge encoder: cat(onehot_lab, onehot_sign) @ AB @ We_l + b_el @ We_l
    AB = jnp.concatenate([params["w_strand"] @ params["w_el_s"],
                          params["w_sign"] @ params["w_el_g"]], axis=0)      # [L1+3, 16]
    we_fold = jnp.einsum("ik,lkd->lid", AB, params["we"])                    # [L, L1+3, D]
    be_fold = jnp.einsum("ik,lkd->lid", params["b_el"], params["we"])        # [L, 1, D]
    return dict(
        w_strand=params["w_strand"], pos_sum=params["pos_sum"],
        w_qkvs=w_qkvs, b_qkvs=b_qkvs,
        we2=jnp.concatenate([we_fold, we_fold], axis=-1),   # duplicated for k|v halves
        be2=jnp.concatenate([be_fold, be_fold], axis=-1),
        ln_g=params["ln_g"], ln_b=params["ln_b"],
        wp=params["wp"], bp=params["bp"],
        wv1=params["wv1"], bv1=params["bv1"],
        wv2=params["wv2"], bv2=params["bv2"],
    )


# -----------------------------------------------------------------------------
# Graph construction from a PD code (batched dense form + index form for the ref)
# -----------------------------------------------------------------------------
def build_graph_batch(pd_code, max_label, n_pad, e_pad, num_heads, batch):
    n_real = len(pd_code)
    L1 = max_label + 1
    label_to_nodes = {}
    for i, crossing in enumerate(pd_code):
        for lab in crossing[:4]:
            label_to_nodes.setdefault(int(lab), []).append(i)
    src, dst, e_lab, e_sign = [], [], [], []
    for lab, nodes in sorted(label_to_nodes.items()):
        if len(nodes) == 2 and nodes[0] != nodes[1]:
            a, b = nodes
            for s, d in ((a, b), (b, a)):
                src.append(s); dst.append(d)
                e_lab.append(lab); e_sign.append(lab % 3)
    e_real = len(src)
    assert e_real <= e_pad and n_real <= n_pad

    node_cnt = np.zeros((n_pad, L1), np.float32)
    for i, crossing in enumerate(pd_code):
        for lab in crossing[:4]:
            node_cnt[i, int(lab)] += 1.0
    edge_cat = np.zeros((e_pad, L1 + 3), np.float32)     # [one-hot label | one-hot sign]
    src_oh = np.zeros((e_pad, n_pad), np.float32)
    dst_oh_t = np.zeros((n_pad, e_pad), np.float32)
    for e in range(e_real):
        edge_cat[e, e_lab[e]] = 1.0
        edge_cat[e, L1 + e_sign[e]] = 1.0
        src_oh[e, src[e]] = 1.0
        dst_oh_t[dst[e], e] = 1.0
    node_mask = np.zeros((n_pad, 1), np.float32)
    node_mask[:n_real, 0] = 1.0
    # block-diagonal (per-head) destination mask for the fused multi-head softmax
    mask_blk = np.kron(np.eye(num_heads, dtype=np.float32), dst_oh_t)

    def rep(a):
        return jnp.asarray(np.broadcast_to(a[None], (batch,) + a.shape).copy())

    graph = dict(node_cnt=rep(node_cnt), edge_cat=rep(edge_cat), src_oh=rep(src_oh),
                 mask_blk=rep(mask_blk), node_mask=rep(node_mask))
    idx = dict(src=np.array(src), dst=np.array(dst),
               e_lab=np.array(e_lab), e_sign=np.array(e_sign))
    return graph, idx, n_real, e_real


# -----------------------------------------------------------------------------
# Pure-JAX reference (index/scatter based, unfused params) for validation
# -----------------------------------------------------------------------------
def reference_forward(pd_code, idx, params, *, hidden_dim, num_heads, num_layers):
    D, H = hidden_dim, num_heads
    C = D // H
    N = len(pd_code)
    labels = jnp.asarray([[int(l) for l in c[:4]] for c in pd_code], jnp.int32)
    x = params["w_strand"][labels].sum(axis=1) + params["pos_sum"]
    src = jnp.asarray(idx["src"]); dst = jnp.asarray(idx["dst"])
    e_lab = jnp.asarray(idx["e_lab"]); e_sign = jnp.asarray(idx["e_sign"])
    e_feat = (params["w_strand"][e_lab] @ params["w_el_s"]
              + params["w_sign"][e_sign] @ params["w_el_g"] + params["b_el"])
    E = src.shape[0]
    for li in range(num_layers):
        q = x @ params["wq"][li] + params["bq"][li]
        k = x @ params["wk"][li] + params["bk"][li]
        v = x @ params["wv"][li] + params["bv"][li]
        e_emb = e_feat @ params["we"][li]
        qe = q[dst].reshape(E, H, C)
        ke = (k[src] + e_emb).reshape(E, H, C)
        ve = (v[src] + e_emb).reshape(E, H, C)
        s = (qe * ke).sum(-1) / np.sqrt(C)
        m = jax.ops.segment_max(s, dst, num_segments=N)
        a = jnp.exp(s - m[dst])
        den = jax.ops.segment_sum(a, dst, num_segments=N)
        alpha = a / den[dst]
        agg = jax.ops.segment_sum(alpha[..., None] * ve, dst, num_segments=N).reshape(N, D)
        x_new = agg + x @ params["wskip"][li] + params["bskip"][li]
        if li < num_layers - 1:
            mu = x_new.mean(-1, keepdims=True)
            var = ((x_new - mu) ** 2).mean(-1, keepdims=True)
            xn = (x_new - mu) / jnp.sqrt(var + 1e-5)
            x = jnp.maximum(xn * params["ln_g"][li] + params["ln_b"][li], 0.0)
        else:
            x = x_new
    node_policy = x @ params["wp"] + params["bp"]
    policy = node_policy.reshape(1, -1)
    graph_feat = x.mean(0, keepdims=True)
    v1 = jnp.maximum(graph_feat @ params["wv1"] + params["bv1"], 0.0)
    value = jnp.tanh(v1 @ params["wv2"] + params["bv2"])
    return policy, value


# -----------------------------------------------------------------------------
if __name__ == "__main__":
    hidden_dim = 32          # embed_dim == transformer hidden size
    num_heads = 4            # per-head channels = 8, concat -> 32
    num_layers = 3
    max_strand_label = 12
    batch = 4                # graphs per pallas_call (parallel grid axis)
    pd_code = [[1, 4, 2, 5], [3, 6, 4, 1], [5, 2, 6, 3]]   # trefoil PD code (3 crossings)
    n_pad, e_pad = 8, 16

    graph, idx, n_real, e_real = build_graph_batch(
        pd_code, max_strand_label, n_pad, e_pad, num_heads, batch)
    params = init_params(jax.random.PRNGKey(0), max_label=max_strand_label,
                         hidden_dim=hidden_dim, num_layers=num_layers)
    packed = pack_params(params)

    policy, value = knot_graph_net_pallas(
        graph, packed, num_layers=num_layers, num_heads=num_heads, n_real=n_real)
    jax.block_until_ready((policy, value))

    ref_policy, ref_value = reference_forward(
        pd_code, idx, params, hidden_dim=hidden_dim,
        num_heads=num_heads, num_layers=num_layers)
    # tolerance slightly looser than before: approx-reciprocal softmax + folded
    # edge-encoder weights reassociate a few f32 ops
    np.testing.assert_allclose(np.asarray(policy),
                               np.tile(np.asarray(ref_policy), (batch, 1)),
                               rtol=5e-3, atol=5e-3)
    np.testing.assert_allclose(np.asarray(value),
                               np.tile(np.asarray(ref_value), (batch, 1)),
                               rtol=5e-3, atol=5e-3)
    assert policy.shape == (batch, 2 * n_real) and value.shape == (batch, 1)
    print("KERNEL_OK")
</pallas_src>

<mosaic_0001>
module attributes {stable_mosaic.version = 11 : i64} {
  func.func @knot_graph_kernel(%arg0: i32, %arg1: memref<1x8x13xf32, #tpu.memory_space<vmem>>, %arg2: memref<1x16x16xf32, #tpu.memory_space<vmem>>, %arg3: memref<1x16x8xf32, #tpu.memory_space<vmem>>, %arg4: memref<1x32x64xf32, #tpu.memory_space<vmem>>, %arg5: memref<1x8x1xf32, #tpu.memory_space<vmem>>, %arg6: memref<13x32xf32, #tpu.memory_space<vmem>>, %arg7: memref<1x32xf32, #tpu.memory_space<vmem>>, %arg8: memref<3x32x128xf32, #tpu.memory_space<vmem>>, %arg9: memref<3x1x128xf32, #tpu.memory_space<vmem>>, %arg10: memref<3x16x64xf32, #tpu.memory_space<vmem>>, %arg11: memref<3x1x64xf32, #tpu.memory_space<vmem>>, %arg12: memref<2x1x32xf32, #tpu.memory_space<vmem>>, %arg13: memref<2x1x32xf32, #tpu.memory_space<vmem>>, %arg14: memref<32x2xf32, #tpu.memory_space<vmem>>, %arg15: memref<1x2xf32, #tpu.memory_space<vmem>>, %arg16: memref<32x32xf32, #tpu.memory_space<vmem>>, %arg17: memref<1x32xf32, #tpu.memory_space<vmem>>, %arg18: memref<32x1xf32, #tpu.memory_space<vmem>>, %arg19: memref<1x1xf32, #tpu.memory_space<vmem>>, %arg20: memref<1x8x2xf32, #tpu.memory_space<vmem>>, %arg21: memref<1x1x1xf32, #tpu.memory_space<vmem>>, %arg22: memref<8x32xf32, #tpu.memory_space<vmem>>) attributes {dimension_semantics = [#tpu.dimension_semantics<parallel>], iteration_bounds = array<i64: 4>, scalar_prefetch = 0 : i64, scratch_operands = 1 : i64, tpu.core_type = #tpu.core_type<tc>, window_params = [{transform_indices = @transform_0, window_bounds = array<i64: 1, 8, 13>}, {transform_indices = @transform_1, window_bounds = array<i64: 1, 16, 16>}, {transform_indices = @transform_2, window_bounds = array<i64: 1, 16, 8>}, {transform_indices = @transform_3, window_bounds = array<i64: 1, 32, 64>}, {transform_indices = @transform_4, window_bounds = array<i64: 1, 8, 1>}, {pipeline_mode = #tpu.pipeline_mode<synchronous>, transform_indices = @transform_5, window_bounds = array<i64: 13, 32>}, {pipeline_mode = #tpu.pipeline_mode<synchronous>, transform_indices = @transform_6, window_bounds = array<i64: 1, 32>}, {pipeline_mode = #tpu.pipeline_mode<synchronous>, transform_indices = @transform_7, window_bounds = array<i64: 3, 32, 128>}, {pipeline_mode = #tpu.pipeline_mode<synchronous>, transform_indices = @transform_8, window_bounds = array<i64: 3, 1, 128>}, {pipeline_mode = #tpu.pipeline_mode<synchronous>, transform_indices = @transform_9, window_bounds = array<i64: 3, 16, 64>}, {pipeline_mode = #tpu.pipeline_mode<synchronous>, transform_indices = @transform_10, window_bounds = array<i64: 3, 1, 64>}, {pipeline_mode = #tpu.pipeline_mode<synchronous>, transform_indices = @transform_11, window_bounds = array<i64: 2, 1, 32>}, {pipeline_mode = #tpu.pipeline_mode<synchronous>, transform_indices = @transform_12, window_bounds = array<i64: 2, 1, 32>}, {pipeline_mode = #tpu.pipeline_mode<synchronous>, transform_indices = @transform_13, window_bounds = array<i64: 32, 2>}, {pipeline_mode = #tpu.pipeline_mode<synchronous>, transform_indices = @transform_14, window_bounds = array<i64: 1, 2>}, {pipeline_mode = #tpu.pipeline_mode<synchronous>, transform_indices = @transform_15, window_bounds = array<i64: 32, 32>}, {pipeline_mode = #tpu.pipeline_mode<synchronous>, transform_indices = @transform_16, window_bounds = array<i64: 1, 32>}, {pipeline_mode = #tpu.pipeline_mode<synchronous>, transform_indices = @transform_17, window_bounds = array<i64: 32, 1>}, {pipeline_mode = #tpu.pipeline_mode<synchronous>, transform_indices = @transform_18, window_bounds = array<i64: 1, 1>}, {transform_indices = @transform_19, window_bounds = array<i64: 1, 8, 2>}, {transform_indices = @transform_20, window_bounds = array<i64: 1, 1, 1>}]} {
    %c0 = arith.constant 0 : index
    %c0_0 = arith.constant 0 : index
    %c0_1 = arith.constant 0 : index
    %0 = vector.load %arg1[%c0, %c0_0, %c0_1] : memref<1x8x13xf32, #tpu.memory_space<vmem>>, vector<1x8x13xf32>
    %1 = vector.shape_cast %0 : vector<1x8x13xf32> to vector<8x13xf32>
    %c0_2 = arith.constant 0 : index
    %c0_3 = arith.constant 0 : index
    %2 = vector.load %arg6[%c0_2, %c0_3] : memref<13x32xf32, #tpu.memory_space<vmem>>, vector<13x32xf32>
    %cst = arith.constant dense<0.000000e+00> : vector<8x32xf32>
    %3 = tpu.matmul %1, %2, %cst {dimension_numbers = #tpu.dot_dimension_numbers<[1], [0], [0], [1], [0, 0, 1, 1], [], []>} : vector<8x13xf32>, vector<13x32xf32>, vector<8x32xf32> -> vector<8x32xf32>
    %c0_4 = arith.constant 0 : index
    %c0_5 = arith.constant 0 : index
    %4 = vector.load %arg7[%c0_4, %c0_5] : memref<1x32xf32, #tpu.memory_space<vmem>>, vector<1x32xf32>
    %5 = vector.broadcast %4 : vector<1x32xf32> to vector<8x32xf32>
    %6 = arith.addf %3, %5 : vector<8x32xf32>
    %c0_6 = arith.constant 0 : index
    %c0_7 = arith.constant 0 : index
    %c0_8 = arith.constant 0 : index
    %7 = vector.load %arg2[%c0_6, %c0_7, %c0_8] : memref<1x16x16xf32, #tpu.memory_space<vmem>>, vector<1x16x16xf32>
    %8 = vector.shape_cast %7 : vector<1x16x16xf32> to vector<16x16xf32>
    %c0_9 = arith.constant 0 : index
    %c0_10 = arith.constant 0 : index
    %c0_11 = arith.constant 0 : index
    %9 = vector.load %arg3[%c0_9, %c0_10, %c0_11] : memref<1x16x8xf32, #tpu.memory_space<vmem>>, vector<1x16x8xf32>
    %10 = vector.shape_cast %9 : vector<1x16x8xf32> to vector<16x8xf32>
    %c0_12 = arith.constant 0 : index
    %c0_13 = arith.constant 0 : index
    %c0_14 = arith.constant 0 : index
    %11 = vector.load %arg4[%c0_12, %c0_13, %c0_14] : memref<1x32x64xf32, #tpu.memory_space<vmem>>, vector<1x32x64xf32>
    %12 = vector.shape_cast %11 : vector<1x32x64xf32> to vector<32x64xf32>
    %cst_15 = arith.constant 0.000000e+00 : f32
    %13 = vector.broadcast %cst_15 : f32 to vector<32x64xf32>
    %14 = arith.cmpf ogt, %12, %13 : vector<32x64xf32>
    %c0_16 = arith.constant 0 : index
    %c0_17 = arith.constant 0 : index
    %c0_18 = arith.constant 0 : index
    %15 = vector.load %arg8[%c0_16, %c0_17, %c0_18] : memref<3x32x128xf32, #tpu.memory_space<vmem>>, vector<1x32x128xf32>
    %16 = vector.shape_cast %15 : vector<1x32x128xf32> to vector<32x128xf32>
    %cst_19 = arith.constant dense<0.000000e+00> : vector<8x128xf32>
    %17 = tpu.matmul %6, %16, %cst_19 {dimension_numbers = #tpu.dot_dimension_numbers<[1], [0], [0], [1], [0, 0, 1, 1], [], []>} : vector<8x32xf32>, vector<32x128xf32>, vector<8x128xf32> -> vector<8x128xf32>
    %c0_20 = arith.constant 0 : index
    %c0_21 = arith.constant 0 : index
    %c0_22 = arith.constant 0 : index
    %18 = vector.load %arg9[%c0_20, %c0_21, %c0_22] : memref<3x1x128xf32, #tpu.memory_space<vmem>>, vector<1x1x128xf32>
    %19 = vector.shape_cast %18 : vector<1x1x128xf32> to vector<1x128xf32>
    %20 = vector.broadcast %19 : vector<1x128xf32> to vector<8x128xf32>
    %21 = arith.addf %17, %20 : vector<8x128xf32>
    %22 = vector.extract_strided_slice %21 {offsets = [0, 0], sizes = [8, 32], strides = [1, 1]} : vector<8x128xf32> to vector<8x32xf32>
    %23 = vector.extract_strided_slice %21 {offsets = [0, 32], sizes = [8, 64], strides = [1, 1]} : vector<8x128xf32> to vector<8x64xf32>
    %24 = vector.extract_strided_slice %21 {offsets = [0, 96], sizes = [8, 32], strides = [1, 1]} : vector<8x128xf32> to vector<8x32xf32>
    %c0_23 = arith.constant 0 : index
    %c0_24 = arith.constant 0 : index
    %c0_25 = arith.constant 0 : index
    %25 = vector.load %arg10[%c0_23, %c0_24, %c0_25] : memref<3x16x64xf32, #tpu.memory_space<vmem>>, vector<1x16x64xf32>
    %26 = vector.shape_cast %25 : vector<1x16x64xf32> to vector<16x64xf32>
    %cst_26 = arith.constant dense<0.000000e+00> : vector<16x64xf32>
    %27 = tpu.matmul %8, %26, %cst_26 {dimension_numbers = #tpu.dot_dimension_numbers<[1], [0], [0], [1], [0, 0, 1, 1], [], []>} : vector<16x16xf32>, vector<16x64xf32>, vector<16x64xf32> -> vector<16x64xf32>
    %c0_27 = arith.constant 0 : index
    %c0_28 = arith.constant 0 : index
    %c0_29 = arith.constant 0 : index
    %28 = vector.load %arg11[%c0_27, %c0_28, %c0_29] : memref<3x1x64xf32, #tpu.memory_space<vmem>>, vector<1x1x64xf32>
    %29 = vector.shape_cast %28 : vector<1x1x64xf32> to vector<1x64xf32>
    %30 = vector.broadcast %29 : vector<1x64xf32> to vector<16x64xf32>
    %31 = arith.addf %27, %30 : vector<16x64xf32>
    %cst_30 = arith.constant dense<0.000000e+00> : vector<16x64xf32>
    %32 = tpu.matmul %10, %23, %cst_30 {dimension_numbers = #tpu.dot_dimension_numbers<[1], [0], [0], [1], [0, 0, 1, 1], [], []>} : vector<16x8xf32>, vector<8x64xf32>, vector<16x64xf32> -> vector<16x64xf32>
    %33 = arith.addf %32, %31 : vector<16x64xf32>
    %34 = vector.extract_strided_slice %22 {offsets = [0, 0], sizes = [8, 8], strides = [1, 1]} : vector<8x32xf32> to vector<8x8xf32>
    %35 = vector.extract_strided_slice %22 {offsets = [0, 8], sizes = [8, 8], strides = [1, 1]} : vector<8x32xf32> to vector<8x8xf32>
    %36 = vector.extract_strided_slice %22 {offsets = [0, 16], sizes = [8, 8], strides = [1, 1]} : vector<8x32xf32> to vector<8x8xf32>
    %37 = vector.extract_strided_slice %22 {offsets = [0, 24], sizes = [8, 8], strides = [1, 1]} : vector<8x32xf32> to vector<8x8xf32>
    %38 = tpu.concatenate %34, %35, %36, %37 in 0 : vector<8x8xf32>, vector<8x8xf32>, vector<8x8xf32>, vector<8x8xf32> -> vector<32x8xf32>
    %39 = vector.extract_strided_slice %33 {offsets = [0, 0], sizes = [16, 8], strides = [1, 1]} : vector<16x64xf32> to vector<16x8xf32>
    %40 = vector.extract_strided_slice %33 {offsets = [0, 8], sizes = [16, 8], strides = [1, 1]} : vector<16x64xf32> to vector<16x8xf32>
    %41 = vector.extract_strided_slice %33 {offsets = [0, 16], sizes = [16, 8], strides = [1, 1]} : vector<16x64xf32> to vector<16x8xf32>
    %42 = vector.extract_strided_slice %33 {offsets = [0, 24], sizes = [16, 8], strides = [1, 1]} : vector<16x64xf32> to vector<16x8xf32>
    %43 = tpu.concatenate %39, %40, %41, %42 in 0 : vector<16x8xf32>, vector<16x8xf32>, vector<16x8xf32>, vector<16x8xf32> -> vector<64x8xf32>
    %44 = vector.extract_strided_slice %33 {offsets = [0, 32], sizes = [16, 8], strides = [1, 1]} : vector<16x64xf32> to vector<16x8xf32>
    %45 = vector.extract_strided_slice %33 {offsets = [0, 40], sizes = [16, 8], strides = [1, 1]} : vector<16x64xf32> to vector<16x8xf32>
    %46 = vector.extract_strided_slice %33 {offsets = [0, 48], sizes = [16, 8], strides = [1, 1]} : vector<16x64xf32> to vector<16x8xf32>
    %47 = vector.extract_strided_slice %33 {offsets = [0, 56], sizes = [16, 8], strides = [1, 1]} : vector<16x64xf32> to vector<16x8xf32>
    %48 = tpu.concatenate %44, %45, %46, %47 in 0 : vector<16x8xf32>, vector<16x8xf32>, vector<16x8xf32>, vector<16x8xf32> -> vector<64x8xf32>
    %cst_31 = arith.constant dense<0.000000e+00> : vector<32x64xf32>
    %49 = tpu.matmul %38, %43, %cst_31 {dimension_numbers = #tpu.dot_dimension_numbers<[1], [1], [0], [0], [0, 0, 1, 0], [], []>} : vector<32x8xf32>, vector<64x8xf32>, vector<32x64xf32> -> vector<32x64xf32>
    %cst_32 = arith.constant 0.353553385 : f32
    %50 = vector.broadcast %cst_32 : f32 to vector<32x64xf32>
    %51 = arith.mulf %49, %50 : vector<32x64xf32>
    %cst_33 = arith.constant -1.000000e+30 : f32
    %52 = vector.broadcast %cst_33 : f32 to vector<32x64xf32>
    %53 = arith.select %14, %51, %52 : vector<32x64xi1>, vector<32x64xf32>
    %cst_34 = arith.constant dense<0xFF800000> : vector<32xf32>
    %54 = vector.multi_reduction <maximumf>, %53, %cst_34 [1] : vector<32x64xf32> to vector<32xf32>
    %55 = vector.shape_cast %54 : vector<32xf32> to vector<32x1xf32>
    %cst_35 = arith.constant -1.000000e+29 : f32
    %56 = vector.broadcast %cst_35 : f32 to vector<32x1xf32>
    %57 = arith.cmpf olt, %55, %56 : vector<32x1xf32>
    %cst_36 = arith.constant 0.000000e+00 : f32
    %58 = vector.broadcast %cst_36 : f32 to vector<32x1xf32>
    %59 = arith.select %57, %58, %55 : vector<32x1xi1>, vector<32x1xf32>
    %60 = vector.broadcast %59 : vector<32x1xf32> to vector<32x64xf32>
    %61 = arith.subf %51, %60 : vector<32x64xf32>
    %62 = math.exp %61 : vector<32x64xf32>
    %cst_37 = arith.constant 0.000000e+00 : f32
    %63 = vector.broadcast %cst_37 : f32 to vector<32x64xf32>
    %64 = arith.select %14, %62, %63 : vector<32x64xi1>, vector<32x64xf32>
    %cst_38 = arith.constant dense<0.000000e+00> : vector<32xf32>
    %65 = vector.multi_reduction <add>, %64, %cst_38 [1] : vector<32x64xf32> to vector<32xf32>
    %66 = vector.shape_cast %65 : vector<32xf32> to vector<32x1xf32>
    %cst_39 = arith.constant 0.000000e+00 : f32
    %67 = vector.broadcast %cst_39 : f32 to vector<32x1xf32>
    %68 = arith.cmpf ogt, %66, %67 : vector<32x1xf32>
    %cst_40 = arith.constant 1.000000e+00 : f32
    %69 = vector.broadcast %cst_40 : f32 to vector<32x1xf32>
    %70 = arith.select %68, %66, %69 : vector<32x1xi1>, vector<32x1xf32>
    %71 = tpu.reciprocal %70 {approx = true} : vector<32x1xf32> -> vector<32x1xf32>
    %72 = vector.broadcast %71 : vector<32x1xf32> to vector<32x64xf32>
    %73 = arith.mulf %64, %72 : vector<32x64xf32>
    %cst_41 = arith.constant dense<0.000000e+00> : vector<32x8xf32>
    %74 = tpu.matmul %73, %48, %cst_41 {dimension_numbers = #tpu.dot_dimension_numbers<[1], [0], [0], [1], [0, 0, 1, 1], [], []>} : vector<32x64xf32>, vector<64x8xf32>, vector<32x8xf32> -> vector<32x8xf32>
    %75 = vector.extract_strided_slice %74 {offsets = [0, 0], sizes = [8, 8], strides = [1, 1]} : vector<32x8xf32> to vector<8x8xf32>
    %c0_42 = arith.constant 0 : index
    %c0_43 = arith.constant 0 : index
    %76 = vector.load %arg22[%c0_42, %c0_43] : memref<8x32xf32, #tpu.memory_space<vmem>>, vector<8x8xf32>
    tpu.vector_store %arg22[%c0_42, %c0_43], %75 {strides = array<i32>} : memref<8x32xf32, #tpu.memory_space<vmem>>, vector<8x8xf32>,
    %77 = vector.extract_strided_slice %74 {offsets = [8, 0], sizes = [8, 8], strides = [1, 1]} : vector<32x8xf32> to vector<8x8xf32>
    %c0_44 = arith.constant 0 : index
    %c8 = arith.constant 8 : index
    %78 = vector.load %arg22[%c0_44, %c8] : memref<8x32xf32, #tpu.memory_space<vmem>>, vector<8x8xf32>
    tpu.vector_store %arg22[%c0_44, %c8], %77 {strides = array<i32>} : memref<8x32xf32, #tpu.memory_space<vmem>>, vector<8x8xf32>,
    %79 = vector.extract_strided_slice %74 {offsets = [16, 0], sizes = [8, 8], strides = [1, 1]} : vector<32x8xf32> to vector<8x8xf32>
    %c0_45 = arith.constant 0 : index
    %c16 = arith.constant 16 : index
    %80 = vector.load %arg22[%c0_45, %c16] : memref<8x32xf32, #tpu.memory_space<vmem>>, vector<8x8xf32>
    tpu.vector_store %arg22[%c0_45, %c16], %79 {strides = array<i32>} : memref<8x32xf32, #tpu.memory_space<vmem>>, vector<8x8xf32>,
    %81 = vector.extract_strided_slice %74 {offsets = [24, 0], sizes = [8, 8], strides = [1, 1]} : vector<32x8xf32> to vector<8x8xf32>
    %c0_46 = arith.constant 0 : index
    %c24 = arith.constant 24 : index
    %82 = vector.load %arg22[%c0_46, %c24] : memref<8x32xf32, #tpu.memory_space<vmem>>, vector<8x8xf32>
    tpu.vector_store %arg22[%c0_46, %c24], %81 {strides = array<i32>} : memref<8x32xf32, #tpu.memory_space<vmem>>, vector<8x8xf32>,
    %c0_47 = arith.constant 0 : index
    %c0_48 = arith.constant 0 : index
    %83 = vector.load %arg22[%c0_47, %c0_48] : memref<8x32xf32, #tpu.memory_space<vmem>>, vector<8x32xf32>
    %84 = arith.addf %83, %24 : vector<8x32xf32>
    %cst_49 = arith.constant dense<0.000000e+00> : vector<8xf32>
    %85 = vector.multi_reduction <add>, %84, %cst_49 [1] : vector<8x32xf32> to vector<8xf32>
    %86 = vector.shape_cast %85 : vector<8xf32> to vector<8x1xf32>
    %cst_50 = arith.constant 3.200000e+01 : f32
    %87 = vector.broadcast %cst_50 : f32 to vector<8x1xf32>
    %88 = arith.divf %86, %87 : vector<8x1xf32>
    %89 = vector.broadcast %88 : vector<8x1xf32> to vector<8x32xf32>
    %90 = arith.subf %84, %89 : vector<8x32xf32>
    %91 = arith.mulf %90, %90 : vector<8x32xf32>
    %cst_51 = arith.constant dense<0.000000e+00> : vector<8xf32>
    %92 = vector.multi_reduction <add>, %91, %cst_51 [1] : vector<8x32xf32> to vector<8xf32>
    %93 = vector.shape_cast %92 : vector<8xf32> to vector<8x1xf32>
    %cst_52 = arith.constant 3.200000e+01 : f32
    %94 = vector.broadcast %cst_52 : f32 to vector<8x1xf32>
    %95 = arith.divf %93, %94 : vector<8x1xf32>
    %96 = vector.broadcast %88 : vector<8x1xf32> to vector<8x32xf32>
    %97 = arith.subf %84, %96 : vector<8x32xf32>
    %cst_53 = arith.constant 9.99999974E-6 : f32
    %98 = vector.broadcast %cst_53 : f32 to vector<8x1xf32>
    %99 = arith.addf %95, %98 : vector<8x1xf32>
    %100 = math.rsqrt %99 : vector<8x1xf32>
    %101 = vector.broadcast %100 : vector<8x1xf32> to vector<8x32xf32>
    %102 = arith.mulf %97, %101 : vector<8x32xf32>
    %c0_54 = arith.constant 0 : index
    %c0_55 = arith.constant 0 : index
    %c0_56 = arith.constant 0 : index
    %103 = vector.load %arg12[%c0_54, %c0_55, %c0_56] : memref<2x1x32xf32, #tpu.memory_space<vmem>>, vector<1x1x32xf32>
    %104 = vector.shape_cast %103 : vector<1x1x32xf32> to vector<1x32xf32>
    %105 = vector.broadcast %104 : vector<1x32xf32> to vector<8x32xf32>
    %106 = arith.mulf %102, %105 : vector<8x32xf32>
    %c0_57 = arith.constant 0 : index
    %c0_58 = arith.constant 0 : index
    %c0_59 = arith.constant 0 : index
    %107 = vector.load %arg13[%c0_57, %c0_58, %c0_59] : memref<2x1x32xf32, #tpu.memory_space<vmem>>, vector<1x1x32xf32>
    %108 = vector.shape_cast %107 : vector<1x1x32xf32> to vector<1x32xf32>
    %109 = vector.broadcast %108 : vector<1x32xf32> to vector<8x32xf32>
    %110 = arith.addf %106, %109 : vector<8x32xf32>
    %cst_60 = arith.constant 0.000000e+00 : f32
    %111 = vector.broadcast %cst_60 : f32 to vector<8x32xf32>
    %112 = arith.maximumf %110, %111 : vector<8x32xf32>
    %c1 = arith.constant 1 : index
    %c0_61 = arith.constant 0 : index
    %c0_62 = arith.constant 0 : index
    %113 = vector.load %arg8[%c1, %c0_61, %c0_62] : memref<3x32x128xf32, #tpu.memory_space<vmem>>, vector<1x32x128xf32>
    %114 = vector.shape_cast %113 : vector<1x32x128xf32> to vector<32x128xf32>
    %cst_63 = arith.constant dense<0.000000e+00> : vector<8x128xf32>
    %115 = tpu.matmul %112, %114, %cst_63 {dimension_numbers = #tpu.dot_dimension_numbers<[1], [0], [0], [1], [0, 0, 1, 1], [], []>} : vector<8x32xf32>, vector<32x128xf32>, vector<8x128xf32> -> vector<8x128xf32>
    %c1_64 = arith.constant 1 : index
    %c0_65 = arith.constant 0 : index
    %c0_66 = arith.constant 0 : index
    %116 = vector.load %arg9[%c1_64, %c0_65, %c0_66] : memref<3x1x128xf32, #tpu.memory_space<vmem>>, vector<1x1x128xf32>
    %117 = vector.shape_cast %116 : vector<1x1x128xf32> to vector<1x128xf32>
    %118 = vector.broadcast %117 : vector<1x128xf32> to vector<8x128xf32>
    %119 = arith.addf %115, %118 : vector<8x128xf32>
    %120 = vector.extract_strided_slice %119 {offsets = [0, 0], sizes = [8, 32], strides = [1, 1]} : vector<8x128xf32> to vector<8x32xf32>
    %121 = vector.extract_strided_slice %119 {offsets = [0, 32], sizes = [8, 64], strides = [1, 1]} : vector<8x128xf32> to vector<8x64xf32>
    %122 = vector.extract_strided_slice %119 {offsets = [0, 96], sizes = [8, 32], strides = [1, 1]} : vector<8x128xf32> to vector<8x32xf32>
    %c1_67 = arith.constant 1 : index
    %c0_68 = arith.constant 0 : index
    %c0_69 = arith.constant 0 : index
    %123 = vector.load %arg10[%c1_67, %c0_68, %c0_69] : memref<3x16x64xf32, #tpu.memory_space<vmem>>, vector<1x16x64xf32>
    %124 = vector.shape_cast %123 : vector<1x16x64xf32> to vector<16x64xf32>
    %cst_70 = arith.constant dense<0.000000e+00> : vector<16x64xf32>
    %125 = tpu.matmul %8, %124, %cst_70 {dimension_numbers = #tpu.dot_dimension_numbers<[1], [0], [0], [1], [0, 0, 1, 1], [], []>} : vector<16x16xf32>, vector<16x64xf32>, vector<16x64xf32> -> vector<16x64xf32>
    %c1_71 = arith.constant 1 : index
    %c0_72 = arith.constant 0 : index
    %c0_73 = arith.constant 0 : index
    %126 = vector.load %arg11[%c1_71, %c0_72, %c0_73] : memref<3x1x64xf32, #tpu.memory_space<vmem>>, vector<1x1x64xf32>
    %127 = vector.shape_cast %126 : vector<1x1x64xf32> to vector<1x64xf32>
    %128 = vector.broadcast %127 : vector<1x64xf32> to vector<16x64xf32>
    %129 = arith.addf %125, %128 : vector<16x64xf32>
    %cst_74 = arith.constant dense<0.000000e+00> : vector<16x64xf32>
    %130 = tpu.matmul %10, %121, %cst_74 {dimension_numbers = #tpu.dot_dimension_numbers<[1], [0], [0], [1], [0, 0, 1, 1], [], []>} : vector<16x8xf32>, vector<8x64xf32>, vector<16x64xf32> -> vector<16x64xf32>
    %131 = arith.addf %130, %129 : vector<16x64xf32>
    %132 = vector.extract_strided_slice %120 {offsets = [0, 0], sizes = [8, 8], strides = [1, 1]} : vector<8x32xf32> to vector<8x8xf32>
    %133 = vector.extract_strided_slice %120 {offsets = [0, 8], sizes = [8, 8], strides = [1, 1]} : vector<8x32xf32> to vector<8x8xf32>
    %134 = vector.extract_strided_slice %120 {offsets = [0, 16], sizes = [8, 8], strides = [1, 1]} : vector<8x32xf32> to vector<8x8xf32>
    %135 = vector.extract_strided_slice %120 {offsets = [0, 24], sizes = [8, 8], strides = [1, 1]} : vector<8x32xf32> to vector<8x8xf32>
    %136 = tpu.concatenate %132, %133, %134, %135 in 0 : vector<8x8xf32>, vector<8x8xf32>, vector<8x8xf32>, vector<8x8xf32> -> vector<32x8xf32>
    %137 = vector.extract_strided_slice %131 {offsets = [0, 0], sizes = [16, 8], strides = [1, 1]} : vector<16x64xf32> to vector<16x8xf32>
    %138 = vector.extract_strided_slice %131 {offsets = [0, 8], sizes = [16, 8], strides = [1, 1]} : vector<16x64xf32> to vector<16x8xf32>
    %139 = vector.extract_strided_slice %131 {offsets = [0, 16], sizes = [16, 8], strides = [1, 1]} : vector<16x64xf32> to vector<16x8xf32>
    %140 = vector.extract_strided_slice %131 {offsets = [0, 24], sizes = [16, 8], strides = [1, 1]} : vector<16x64xf32> to vector<16x8xf32>
    %141 = tpu.concatenate %137, %138, %139, %140 in 0 : vector<16x8xf32>, vector<16x8xf32>, vector<16x8xf32>, vector<16x8xf32> -> vector<64x8xf32>
    %142 = vector.extract_strided_slice %131 {offsets = [0, 32], sizes = [16, 8], strides = [1, 1]} : vector<16x64xf32> to vector<16x8xf32>
    %143 = vector.extract_strided_slice %131 {offsets = [0, 40], sizes = [16, 8], strides = [1, 1]} : vector<16x64xf32> to vector<16x8xf32>
    %144 = vector.extract_strided_slice %131 {offsets = [0, 48], sizes = [16, 8], strides = [1, 1]} : vector<16x64xf32> to vector<16x8xf32>
    %145 = vector.extract_strided_slice %131 {offsets = [0, 56], sizes = [16, 8], strides = [1, 1]} : vector<16x64xf32> to vector<16x8xf32>
    %146 = tpu.concatenate %142, %143, %144, %145 in 0 : vector<16x8xf32>, vector<16x8xf32>, vector<16x8xf32>, vector<16x8xf32> -> vector<64x8xf32>
    %cst_75 = arith.constant dense<0.000000e+00> : vector<32x64xf32>
    %147 = tpu.matmul %136, %141, %cst_75 {dimension_numbers = #tpu.dot_dimension_numbers<[1], [1], [0], [0], [0, 0, 1, 0], [], []>} : vector<32x8xf32>, vector<64x8xf32>, vector<32x64xf32> -> vector<32x64xf32>
    %cst_76 = arith.constant 0.353553385 : f32
    %148 = vector.broadcast %cst_76 : f32 to vector<32x64xf32>
    %149 = arith.mulf %147, %148 : vector<32x64xf32>
    %cst_77 = arith.constant -1.000000e+30 : f32
    %150 = vector.broadcast %cst_77 : f32 to vector<32x64xf32>
    %151 = arith.select %14, %149, %150 : vector<32x64xi1>, vector<32x64xf32>
    %cst_78 = arith.constant dense<0xFF800000> : vector<32xf32>
    %152 = vector.multi_reduction <maximumf>, %151, %cst_78 [1] : vector<32x64xf32> to vector<32xf32>
    %153 = vector.shape_cast %152 : vector<32xf32> to vector<32x1xf32>
    %cst_79 = arith.constant -1.000000e+29 : f32
    %154 = vector.broadcast %cst_79 : f32 to vector<32x1xf32>
    %155 = arith.cmpf olt, %153, %154 : vector<32x1xf32>
    %cst_80 = arith.constant 0.000000e+00 : f32
    %156 = vector.broadcast %cst_80 : f32 to vector<32x1xf32>
    %157 = arith.select %155, %156, %153 : vector<32x1xi1>, vector<32x1xf32>
    %158 = vector.broadcast %157 : vector<32x1xf32> to vector<32x64xf32>
    %159 = arith.subf %149, %158 : vector<32x64xf32>
    %160 = math.exp %159 : vector<32x64xf32>
    %cst_81 = arith.constant 0.000000e+00 : f32
    %161 = vector.broadcast %cst_81 : f32 to vector<32x64xf32>
    %162 = arith.select %14, %160, %161 : vector<32x64xi1>, vector<32x64xf32>
    %cst_82 = arith.constant dense<0.000000e+00> : vector<32xf32>
    %163 = vector.multi_reduction <add>, %162, %cst_82 [1] : vector<32x64xf32> to vector<32xf32>
    %164 = vector.shape_cast %163 : vector<32xf32> to vector<32x1xf32>
    %cst_83 = arith.constant 0.000000e+00 : f32
    %165 = vector.broadcast %cst_83 : f32 to vector<32x1xf32>
    %166 = arith.cmpf ogt, %164, %165 : vector<32x1xf32>
    %cst_84 = arith.constant 1.000000e+00 : f32
    %167 = vector.broadcast %cst_84 : f32 to vector<32x1xf32>
    %168 = arith.select %166, %164, %167 : vector<32x1xi1>, vector<32x1xf32>
    %169 = tpu.reciprocal %168 {approx = true} : vector<32x1xf32> -> vector<32x1xf32>
    %170 = vector.broadcast %169 : vector<32x1xf32> to vector<32x64xf32>
    %171 = arith.mulf %162, %170 : vector<32x64xf32>
    %cst_85 = arith.constant dense<0.000000e+00> : vector<32x8xf32>
    %172 = tpu.matmul %171, %146, %cst_85 {dimension_numbers = #tpu.dot_dimension_numbers<[1], [0], [0], [1], [0, 0, 1, 1], [], []>} : vector<32x64xf32>, vector<64x8xf32>, vector<32x8xf32> -> vector<32x8xf32>
    %173 = vector.extract_strided_slice %172 {offsets = [0, 0], sizes = [8, 8], strides = [1, 1]} : vector<32x8xf32> to vector<8x8xf32>
    %c0_86 = arith.constant 0 : index
    %c0_87 = arith.constant 0 : index
    %174 = vector.load %arg22[%c0_86, %c0_87] : memref<8x32xf32, #tpu.memory_space<vmem>>, vector<8x8xf32>
    tpu.vector_store %arg22[%c0_86, %c0_87], %173 {strides = array<i32>} : memref<8x32xf32, #tpu.memory_space<vmem>>, vector<8x8xf32>,
    %175 = vector.extract_strided_slice %172 {offsets = [8, 0], sizes = [8, 8], strides = [1, 1]} : vector<32x8xf32> to vector<8x8xf32>
    %c0_88 = arith.constant 0 : index
    %c8_89 = arith.constant 8 : index
    %176 = vector.load %arg22[%c0_88, %c8_89] : memref<8x32xf32, #tpu.memory_space<vmem>>, vector<8x8xf32>
    tpu.vector_store %arg22[%c0_88, %c8_89], %175 {strides = array<i32>} : memref<8x32xf32, #tpu.memory_space<vmem>>, vector<8x8xf32>,
    %177 = vector.extract_strided_slice %172 {offsets = [16, 0], sizes = [8, 8], strides = [1, 1]} : vector<32x8xf32> to vector<8x8xf32>
    %c0_90 = arith.constant 0 : index
    %c16_91 = arith.constant 16 : index
    %178 = vector.load %arg22[%c0_90, %c16_91] : memref<8x32xf32, #tpu.memory_space<vmem>>, vector<8x8xf32>
    tpu.vector_store %arg22[%c0_90, %c16_91], %177 {strides = array<i32>} : memref<8x32xf32, #tpu.memory_space<vmem>>, vector<8x8xf32>,
    %179 = vector.extract_strided_slice %172 {offsets = [24, 0], sizes = [8, 8], strides = [1, 1]} : vector<32x8xf32> to vector<8x8xf32>
    %c0_92 = arith.constant 0 : index
    %c24_93 = arith.constant 24 : index
    %180 = vector.load %arg22[%c0_92, %c24_93] : memref<8x32xf32, #tpu.memory_space<vmem>>, vector<8x8xf32>
    tpu.vector_store %arg22[%c0_92, %c24_93], %179 {strides = array<i32>} : memref<8x32xf32, #tpu.memory_space<vmem>>, vector<8x8xf32>,
    %c0_94 = arith.constant 0 : index
    %c0_95 = arith.constant 0 : index
    %181 = vector.load %arg22[%c0_94, %c0_95] : memref<8x32xf32, #tpu.memory_space<vmem>>, vector<8x32xf32>
    %182 = arith.addf %181, %122 : vector<8x32xf32>
    %cst_96 = arith.constant dense<0.000000e+00> : vector<8xf32>
    %183 = vector.multi_reduction <add>, %182, %cst_96 [1] : vector<8x32xf32> to vector<8xf32>
    %184 = vector.shape_cast %183 : vector<8xf32> to vector<8x1xf32>
    %cst_97 = arith.constant 3.200000e+01 : f32
    %185 = vector.broadcast %cst_97 : f32 to vector<8x1xf32>
    %186 = arith.divf %184, %185 : vector<8x1xf32>
    %187 = vector.broadcast %186 : vector<8x1xf32> to vector<8x32xf32>
    %188 = arith.subf %182, %187 : vector<8x32xf32>
    %189 = arith.mulf %188, %188 : vector<8x32xf32>
    %cst_98 = arith.constant dense<0.000000e+00> : vector<8xf32>
    %190 = vector.multi_reduction <add>, %189, %cst_98 [1] : vector<8x32xf32> to vector<8xf32>
    %191 = vector.shape_cast %190 : vector<8xf32> to vector<8x1xf32>
    %cst_99 = arith.constant 3.200000e+01 : f32
    %192 = vector.broadcast %cst_99 : f32 to vector<8x1xf32>
    %193 = arith.divf %191, %192 : vector<8x1xf32>
    %194 = vector.broadcast %186 : vector<8x1xf32> to vector<8x32xf32>
    %195 = arith.subf %182, %194 : vector<8x32xf32>
    %cst_100 = arith.constant 9.99999974E-6 : f32
    %196 = vector.broadcast %cst_100 : f32 to vector<8x1xf32>
    %197 = arith.addf %193, %196 : vector<8x1xf32>
    %198 = math.rsqrt %197 : vector<8x1xf32>
    %199 = vector.broadcast %198 : vector<8x1xf32> to vector<8x32xf32>
    %200 = arith.mulf %195, %199 : vector<8x32xf32>
    %c1_101 = arith.constant 1 : index
    %c0_102 = arith.constant 0 : index
    %c0_103 = arith.constant 0 : index
    %201 = vector.load %arg12[%c1_101, %c0_102, %c0_103] : memref<2x1x32xf32, #tpu.memory_space<vmem>>, vector<1x1x32xf32>
    %202 = vector.shape_cast %201 : vector<1x1x32xf32> to vector<1x32xf32>
    %203 = vector.broadcast %202 : vector<1x32xf32> to vector<8x32xf32>
    %204 = arith.mulf %200, %203 : vector<8x32xf32>
    %c1_104 = arith.constant 1 : index
    %c0_105 = arith.constant 0 : index
    %c0_106 = arith.constant 0 : index
    %205 = vector.load %arg13[%c1_104, %c0_105, %c0_106] : memref<2x1x32xf32, #tpu.memory_space<vmem>>, vector<1x1x32xf32>
    %206 = vector.shape_cast %205 : vector<1x1x32xf32> to vector<1x32xf32>
    %207 = vector.broadcast %206 : vector<1x32xf32> to vector<8x32xf32>
    %208 = arith.addf %204, %207 : vector<8x32xf32>
    %cst_107 = arith.constant 0.000000e+00 : f32
    %209 = vector.broadcast %cst_107 : f32 to vector<8x32xf32>
    %210 = arith.maximumf %208, %209 : vector<8x32xf32>
    %c2 = arith.constant 2 : index
    %c0_108 = arith.constant 0 : index
    %c0_109 = arith.constant 0 : index
    %211 = vector.load %arg8[%c2, %c0_108, %c0_109] : memref<3x32x128xf32, #tpu.memory_space<vmem>>, vector<1x32x128xf32>
    %212 = vector.shape_cast %211 : vector<1x32x128xf32> to vector<32x128xf32>
    %cst_110 = arith.constant dense<0.000000e+00> : vector<8x128xf32>
    %213 = tpu.matmul %210, %212, %cst_110 {dimension_numbers = #tpu.dot_dimension_numbers<[1], [0], [0], [1], [0, 0, 1, 1], [], []>} : vector<8x32xf32>, vector<32x128xf32>, vector<8x128xf32> -> vector<8x128xf32>
    %c2_111 = arith.constant 2 : index
    %c0_112 = arith.constant 0 : index
    %c0_113 = arith.constant 0 : index
    %214 = vector.load %arg9[%c2_111, %c0_112, %c0_113] : memref<3x1x128xf32, #tpu.memory_space<vmem>>, vector<1x1x128xf32>
    %215 = vector.shape_cast %214 : vector<1x1x128xf32> to vector<1x128xf32>
    %216 = vector.broadcast %215 : vector<1x128xf32> to vector<8x128xf32>
    %217 = arith.addf %213, %216 : vector<8x128xf32>
    %218 = vector.extract_strided_slice %217 {offsets = [0, 0], sizes = [8, 32], strides = [1, 1]} : vector<8x128xf32> to vector<8x32xf32>
    %219 = vector.extract_strided_slice %217 {offsets = [0, 32], sizes = [8, 64], strides = [1, 1]} : vector<8x128xf32> to vector<8x64xf32>
    %220 = vector.extract_strided_slice %217 {offsets = [0, 96], sizes = [8, 32], strides = [1, 1]} : vector<8x128xf32> to vector<8x32xf32>
    %c2_114 = arith.constant 2 : index
    %c0_115 = arith.constant 0 : index
    %c0_116 = arith.constant 0 : index
    %221 = vector.load %arg10[%c2_114, %c0_115, %c0_116] : memref<3x16x64xf32, #tpu.memory_space<vmem>>, vector<1x16x64xf32>
    %222 = vector.shape_cast %221 : vector<1x16x64xf32> to vector<16x64xf32>
    %cst_117 = arith.constant dense<0.000000e+00> : vector<16x64xf32>
    %223 = tpu.matmul %8, %222, %cst_117 {dimension_numbers = #tpu.dot_dimension_numbers<[1], [0], [0], [1], [0, 0, 1, 1], [], []>} : vector<16x16xf32>, vector<16x64xf32>, vector<16x64xf32> -> vector<16x64xf32>
    %c2_118 = arith.constant 2 : index
    %c0_119 = arith.constant 0 : index
    %c0_120 = arith.constant 0 : index
    %224 = vector.load %arg11[%c2_118, %c0_119, %c0_120] : memref<3x1x64xf32, #tpu.memory_space<vmem>>, vector<1x1x64xf32>
    %225 = vector.shape_cast %224 : vector<1x1x64xf32> to vector<1x64xf32>
    %226 = vector.broadcast %225 : vector<1x64xf32> to vector<16x64xf32>
    %227 = arith.addf %223, %226 : vector<16x64xf32>
    %cst_121 = arith.constant dense<0.000000e+00> : vector<16x64xf32>
    %228 = tpu.matmul %10, %219, %cst_121 {dimension_numbers = #tpu.dot_dimension_numbers<[1], [0], [0], [1], [0, 0, 1, 1], [], []>} : vector<16x8xf32>, vector<8x64xf32>, vector<16x64xf32> -> vector<16x64xf32>
    %229 = arith.addf %228, %227 : vector<16x64xf32>
    %230 = vector.extract_strided_slice %218 {offsets = [0, 0], sizes = [8, 8], strides = [1, 1]} : vector<8x32xf32> to vector<8x8xf32>
    %231 = vector.extract_strided_slice %218 {offsets = [0, 8], sizes = [8, 8], strides = [1, 1]} : vector<8x32xf32> to vector<8x8xf32>
    %232 = vector.extract_strided_slice %218 {offsets = [0, 16], sizes = [8, 8], strides = [1, 1]} : vector<8x32xf32> to vector<8x8xf32>
    %233 = vector.extract_strided_slice %218 {offsets = [0, 24], sizes = [8, 8], strides = [1, 1]} : vector<8x32xf32> to vector<8x8xf32>
    %234 = tpu.concatenate %230, %231, %232, %233 in 0 : vector<8x8xf32>, vector<8x8xf32>, vector<8x8xf32>, vector<8x8xf32> -> vector<32x8xf32>
    %235 = vector.extract_strided_slice %229 {offsets = [0, 0], sizes = [16, 8], strides = [1, 1]} : vector<16x64xf32> to vector<16x8xf32>
    %236 = vector.extract_strided_slice %229 {offsets = [0, 8], sizes = [16, 8], strides = [1, 1]} : vector<16x64xf32> to vector<16x8xf32>
    %237 = vector.extract_strided_slice %229 {offsets = [0, 16], sizes = [16, 8], strides = [1, 1]} : vector<16x64xf32> to vector<16x8xf32>
    %238 = vector.extract_strided_slice %229 {offsets = [0, 24], sizes = [16, 8], strides = [1, 1]} : vector<16x64xf32> to vector<16x8xf32>
    %239 = tpu.concatenate %235, %236, %237, %238 in 0 : vector<16x8xf32>, vector<16x8xf32>, vector<16x8xf32>, vector<16x8xf32> -> vector<64x8xf32>
    %240 = vector.extract_strided_slice %229 {offsets = [0, 32], sizes = [16, 8], strides = [1, 1]} : vector<16x64xf32> to vector<16x8xf32>
    %241 = vector.extract_strided_slice %229 {offsets = [0, 40], sizes = [16, 8], strides = [1, 1]} : vector<16x64xf32> to vector<16x8xf32>
    %242 = vector.extract_strided_slice %229 {offsets = [0, 48], sizes = [16, 8], strides = [1, 1]} : vector<16x64xf32> to vector<16x8xf32>
    %243 = vector.extract_strided_slice %229 {offsets = [0, 56], sizes = [16, 8], strides = [1, 1]} : vector<16x64xf32> to vector<16x8xf32>
    %244 = tpu.concatenate %240, %241, %242, %243 in 0 : vector<16x8xf32>, vector<16x8xf32>, vector<16x8xf32>, vector<16x8xf32> -> vector<64x8xf32>
    %cst_122 = arith.constant dense<0.000000e+00> : vector<32x64xf32>
    %245 = tpu.matmul %234, %239, %cst_122 {dimension_numbers = #tpu.dot_dimension_numbers<[1], [1], [0], [0], [0, 0, 1, 0], [], []>} : vector<32x8xf32>, vector<64x8xf32>, vector<32x64xf32> -> vector<32x64xf32>
    %cst_123 = arith.constant 0.353553385 : f32
    %246 = vector.broadcast %cst_123 : f32 to vector<32x64xf32>
    %247 = arith.mulf %245, %246 : vector<32x64xf32>
    %cst_124 = arith.constant -1.000000e+30 : f32
    %248 = vector.broadcast %cst_124 : f32 to vector<32x64xf32>
    %249 = arith.select %14, %247, %248 : vector<32x64xi1>, vector<32x64xf32>
    %cst_125 = arith.constant dense<0xFF800000> : vector<32xf32>
    %250 = vector.multi_reduction <maximumf>, %249, %cst_125 [1] : vector<32x64xf32> to vector<32xf32>
    %251 = vector.shape_cast %250 : vector<32xf32> to vector<32x1xf32>
    %cst_126 = arith.constant -1.000000e+29 : f32
    %252 = vector.broadcast %cst_126 : f32 to vector<32x1xf32>
    %253 = arith.cmpf olt, %251, %252 : vector<32x1xf32>
    %cst_127 = arith.constant 0.000000e+00 : f32
    %254 = vector.broadcast %cst_127 : f32 to vector<32x1xf32>
    %255 = arith.select %253, %254, %251 : vector<32x1xi1>, vector<32x1xf32>
    %256 = vector.broadcast %255 : vector<32x1xf32> to vector<32x64xf32>
    %257 = arith.subf %247, %256 : vector<32x64xf32>
    %258 = math.exp %257 : vector<32x64xf32>
    %cst_128 = arith.constant 0.000000e+00 : f32
    %259 = vector.broadcast %cst_128 : f32 to vector<32x64xf32>
    %260 = arith.select %14, %258, %259 : vector<32x64xi1>, vector<32x64xf32>
    %cst_129 = arith.constant dense<0.000000e+00> : vector<32xf32>
    %261 = vector.multi_reduction <add>, %260, %cst_129 [1] : vector<32x64xf32> to vector<32xf32>
    %262 = vector.shape_cast %261 : vector<32xf32> to vector<32x1xf32>
    %cst_130 = arith.constant 0.000000e+00 : f32
    %263 = vector.broadcast %cst_130 : f32 to vector<32x1xf32>
    %264 = arith.cmpf ogt, %262, %263 : vector<32x1xf32>
    %cst_131 = arith.constant 1.000000e+00 : f32
    %265 = vector.broadcast %cst_131 : f32 to vector<32x1xf32>
    %266 = arith.select %264, %262, %265 : vector<32x1xi1>, vector<32x1xf32>
    %267 = tpu.reciprocal %266 {approx = true} : vector<32x1xf32> -> vector<32x1xf32>
    %268 = vector.broadcast %267 : vector<32x1xf32> to vector<32x64xf32>
    %269 = arith.mulf %260, %268 : vector<32x64xf32>
    %cst_132 = arith.constant dense<0.000000e+00> : vector<32x8xf32>
    %270 = tpu.matmul %269, %244, %cst_132 {dimension_numbers = #tpu.dot_dimension_numbers<[1], [0], [0], [1], [0, 0, 1, 1], [], []>} : vector<32x64xf32>, vector<64x8xf32>, vector<32x8xf32> -> vector<32x8xf32>
    %271 = vector.extract_strided_slice %270 {offsets = [0, 0], sizes = [8, 8], strides = [1, 1]} : vector<32x8xf32> to vector<8x8xf32>
    %c0_133 = arith.constant 0 : index
    %c0_134 = arith.constant 0 : index
    %272 = vector.load %arg22[%c0_133, %c0_134] : memref<8x32xf32, #tpu.memory_space<vmem>>, vector<8x8xf32>
    tpu.vector_store %arg22[%c0_133, %c0_134], %271 {strides = array<i32>} : memref<8x32xf32, #tpu.memory_space<vmem>>, vector<8x8xf32>,
    %273 = vector.extract_strided_slice %270 {offsets = [8, 0], sizes = [8, 8], strides = [1, 1]} : vector<32x8xf32> to vector<8x8xf32>
    %c0_135 = arith.constant 0 : index
    %c8_136 = arith.constant 8 : index
    %274 = vector.load %arg22[%c0_135, %c8_136] : memref<8x32xf32, #tpu.memory_space<vmem>>, vector<8x8xf32>
    tpu.vector_store %arg22[%c0_135, %c8_136], %273 {strides = array<i32>} : memref<8x32xf32, #tpu.memory_space<vmem>>, vector<8x8xf32>,
    %275 = vector.extract_strided_slice %270 {offsets = [16, 0], sizes = [8, 8], strides = [1, 1]} : vector<32x8xf32> to vector<8x8xf32>
    %c0_137 = arith.constant 0 : index
    %c16_138 = arith.constant 16 : index
    %276 = vector.load %arg22[%c0_137, %c16_138] : memref<8x32xf32, #tpu.memory_space<vmem>>, vector<8x8xf32>
    tpu.vector_store %arg22[%c0_137, %c16_138], %275 {strides = array<i32>} : memref<8x32xf32, #tpu.memory_space<vmem>>, vector<8x8xf32>,
    %277 = vector.extract_strided_slice %270 {offsets = [24, 0], sizes = [8, 8], strides = [1, 1]} : vector<32x8xf32> to vector<8x8xf32>
    %c0_139 = arith.constant 0 : index
    %c24_140 = arith.constant 24 : index
    %278 = vector.load %arg22[%c0_139, %c24_140] : memref<8x32xf32, #tpu.memory_space<vmem>>, vector<8x8xf32>
    tpu.vector_store %arg22[%c0_139, %c24_140], %277 {strides = array<i32>} : memref<8x32xf32, #tpu.memory_space<vmem>>, vector<8x8xf32>,
    %c0_141 = arith.constant 0 : index
    %c0_142 = arith.constant 0 : index
    %279 = vector.load %arg22[%c0_141, %c0_142] : memref<8x32xf32, #tpu.memory_space<vmem>>, vector<8x32xf32>
    %280 = arith.addf %279, %220 : vector<8x32xf32>
    %c0_143 = arith.constant 0 : index
    %c0_144 = arith.constant 0 : index
    %281 = vector.load %arg14[%c0_143, %c0_144] : memref<32x2xf32, #tpu.memory_space<vmem>>, vector<32x2xf32>
    %cst_145 = arith.constant dense<0.000000e+00> : vector<8x2xf32>
    %282 = tpu.matmul %280, %281, %cst_145 {dimension_numbers = #tpu.dot_dimension_numbers<[1], [0], [0], [1], [0, 0, 1, 1], [], []>} : vector<8x32xf32>, vector<32x2xf32>, vector<8x2xf32> -> vector<8x2xf32>
    %c0_146 = arith.constant 0 : index
    %c0_147 = arith.constant 0 : index
    %283 = vector.load %arg15[%c0_146, %c0_147] : memref<1x2xf32, #tpu.memory_space<vmem>>, vector<1x2xf32>
    %284 = vector.broadcast %283 : vector<1x2xf32> to vector<8x2xf32>
    %285 = arith.addf %282, %284 : vector<8x2xf32>
    %c0_148 = arith.constant 0 : index
    %c0_149 = arith.constant 0 : index
    %c0_150 = arith.constant 0 : index
    %286 = vector.load %arg20[%c0_148, %c0_149, %c0_150] : memref<1x8x2xf32, #tpu.memory_space<vmem>>, vector<1x8x2xf32>
    %287 = vector.shape_cast %286 : vector<1x8x2xf32> to vector<8x2xf32>
    %288 = vector.shape_cast %285 : vector<8x2xf32> to vector<1x8x2xf32>
    tpu.vector_store %arg20[%c0_148, %c0_149, %c0_150], %288 {strides = array<i32>} : memref<1x8x2xf32, #tpu.memory_space<vmem>>, vector<1x8x2xf32>,
    %c0_151 = arith.constant 0 : index
    %c0_152 = arith.constant 0 : index
    %c0_153 = arith.constant 0 : index
    %289 = vector.load %arg5[%c0_151, %c0_152, %c0_153] : memref<1x8x1xf32, #tpu.memory_space<vmem>>, vector<1x8x1xf32>
    %290 = vector.shape_cast %289 : vector<1x8x1xf32> to vector<8x1xf32>
    %cst_154 = arith.constant dense<0.000000e+00> : vector<1xf32>
    %291 = vector.multi_reduction <add>, %290, %cst_154 [0] : vector<8x1xf32> to vector<1xf32>
    %292 = vector.shape_cast %291 : vector<1xf32> to vector<1x1xf32>
    %293 = vector.broadcast %290 : vector<8x1xf32> to vector<8x32xf32>
    %294 = arith.mulf %280, %293 : vector<8x32xf32>
    %cst_155 = arith.constant dense<0.000000e+00> : vector<32xf32>
    %295 = vector.multi_reduction <add>, %294, %cst_155 [0] : vector<8x32xf32> to vector<32xf32>
    %296 = vector.shape_cast %295 : vector<32xf32> to vector<1x32xf32>
    %297 = vector.broadcast %292 : vector<1x1xf32> to vector<1x32xf32>
    %298 = arith.divf %296, %297 : vector<1x32xf32>
    %c0_156 = arith.constant 0 : index
    %c0_157 = arith.constant 0 : index
    %299 = vector.load %arg16[%c0_156, %c0_157] : memref<32x32xf32, #tpu.memory_space<vmem>>, vector<32x32xf32>
    %cst_158 = arith.constant dense<0.000000e+00> : vector<1x32xf32>
    %300 = tpu.matmul %298, %299, %cst_158 {dimension_numbers = #tpu.dot_dimension_numbers<[1], [0], [0], [1], [0, 0, 1, 1], [], []>} : vector<1x32xf32>, vector<32x32xf32>, vector<1x32xf32> -> vector<1x32xf32>
    %c0_159 = arith.constant 0 : index
    %c0_160 = arith.constant 0 : index
    %301 = vector.load %arg17[%c0_159, %c0_160] : memref<1x32xf32, #tpu.memory_space<vmem>>, vector<1x32xf32>
    %302 = arith.addf %300, %301 : vector<1x32xf32>
    %cst_161 = arith.constant 0.000000e+00 : f32
    %303 = vector.broadcast %cst_161 : f32 to vector<1x32xf32>
    %304 = arith.maximumf %302, %303 : vector<1x32xf32>
    %c0_162 = arith.constant 0 : index
    %c0_163 = arith.constant 0 : index
    %305 = vector.load %arg18[%c0_162, %c0_163] : memref<32x1xf32, #tpu.memory_space<vmem>>, vector<32x1xf32>
    %cst_164 = arith.constant dense<0.000000e+00> : vector<1x1xf32>
    %306 = tpu.matmul %304, %305, %cst_164 {dimension_numbers = #tpu.dot_dimension_numbers<[1], [0], [0], [1], [0, 0, 1, 1], [], []>} : vector<1x32xf32>, vector<32x1xf32>, vector<1x1xf32> -> vector<1x1xf32>
    %c0_165 = arith.constant 0 : index
    %c0_166 = arith.constant 0 : index
    %307 = vector.load %arg19[%c0_165, %c0_166] : memref<1x1xf32, #tpu.memory_space<vmem>>, vector<1x1xf32>
    %308 = arith.addf %306, %307 : vector<1x1xf32>
    %309 = math.tanh %308 : vector<1x1xf32>
    %c0_167 = arith.constant 0 : index
    %c0_168 = arith.constant 0 : index
    %c0_169 = arith.constant 0 : index
    %310 = vector.load %arg21[%c0_167, %c0_168, %c0_169] : memref<1x1x1xf32, #tpu.memory_space<vmem>>, vector<1x1x1xf32>
    %311 = vector.shape_cast %310 : vector<1x1x1xf32> to vector<1x1xf32>
    %312 = vector.shape_cast %309 : vector<1x1xf32> to vector<1x1x1xf32>
    tpu.vector_store %arg21[%c0_167, %c0_168, %c0_169], %312 {strides = array<i32>} : memref<1x1x1xf32, #tpu.memory_space<vmem>>, vector<1x1x1xf32>,
    return
  }
  func.func @transform_0(%arg0: i32) -> (i32, i32, i32) {
    %c0_i32 = arith.constant 0 : i32
    %c0_i32_0 = arith.constant 0 : i32
    %c0_i32_1 = arith.constant 0 : i32
    return %arg0, %c0_i32, %c0_i32_0 : i32, i32, i32
  }
  func.func @transform_1(%arg0: i32) -> (i32, i32, i32) {
    %c0_i32 = arith.constant 0 : i32
    %c0_i32_0 = arith.constant 0 : i32
    %c0_i32_1 = arith.constant 0 : i32
    return %arg0, %c0_i32, %c0_i32_0 : i32, i32, i32
  }
  func.func @transform_2(%arg0: i32) -> (i32, i32, i32) {
    %c0_i32 = arith.constant 0 : i32
    %c0_i32_0 = arith.constant 0 : i32
    %c0_i32_1 = arith.constant 0 : i32
    return %arg0, %c0_i32, %c0_i32_0 : i32, i32, i32
  }
  func.func @transform_3(%arg0: i32) -> (i32, i32, i32) {
    %c0_i32 = arith.constant 0 : i32
    %c0_i32_0 = arith.constant 0 : i32
    %c0_i32_1 = arith.constant 0 : i32
    return %arg0, %c0_i32, %c0_i32_0 : i32, i32, i32
  }
  func.func @transform_4(%arg0: i32) -> (i32, i32, i32) {
    %c0_i32 = arith.constant 0 : i32
    %c0_i32_0 = arith.constant 0 : i32
    %c0_i32_1 = arith.constant 0 : i32
    return %arg0, %c0_i32, %c0_i32_0 : i32, i32, i32
  }
  func.func @transform_5(%arg0: i32) -> (i32, i32) {
    %c0_i32 = arith.constant 0 : i32
    %c0_i32_0 = arith.constant 0 : i32
    %c0_i32_1 = arith.constant 0 : i32
    return %c0_i32, %c0_i32_0 : i32, i32
  }
  func.func @transform_6(%arg0: i32) -> (i32, i32) {
    %c0_i32 = arith.constant 0 : i32
    %c0_i32_0 = arith.constant 0 : i32
    %c0_i32_1 = arith.constant 0 : i32
    return %c0_i32, %c0_i32_0 : i32, i32
  }
  func.func @transform_7(%arg0: i32) -> (i32, i32, i32) {
    %c0_i32 = arith.constant 0 : i32
    %c0_i32_0 = arith.constant 0 : i32
    %c0_i32_1 = arith.constant 0 : i32
    %c0_i32_2 = arith.constant 0 : i32
    return %c0_i32, %c0_i32_0, %c0_i32_1 : i32, i32, i32
  }
  func.func @transform_8(%arg0: i32) -> (i32, i32, i32) {
    %c0_i32 = arith.constant 0 : i32
    %c0_i32_0 = arith.constant 0 : i32
    %c0_i32_1 = arith.constant 0 : i32
    %c0_i32_2 = arith.constant 0 : i32
    return %c0_i32, %c0_i32_0, %c0_i32_1 : i32, i32, i32
  }
  func.func @transform_9(%arg0: i32) -> (i32, i32, i32) {
    %c0_i32 = arith.constant 0 : i32
    %c0_i32_0 = arith.constant 0 : i32
    %c0_i32_1 = arith.constant 0 : i32
    %c0_i32_2 = arith.constant 0 : i32
    return %c0_i32, %c0_i32_0, %c0_i32_1 : i32, i32, i32
  }
  func.func @transform_10(%arg0: i32) -> (i32, i32, i32) {
    %c0_i32 = arith.constant 0 : i32
    %c0_i32_0 = arith.constant 0 : i32
    %c0_i32_1 = arith.constant 0 : i32
    %c0_i32_2 = arith.constant 0 : i32
    return %c0_i32, %c0_i32_0, %c0_i32_1 : i32, i32, i32
  }
  func.func @transform_11(%arg0: i32) -> (i32, i32, i32) {
    %c0_i32 = arith.constant 0 : i32
    %c0_i32_0 = arith.constant 0 : i32
    %c0_i32_1 = arith.constant 0 : i32
    %c0_i32_2 = arith.constant 0 : i32
    return %c0_i32, %c0_i32_0, %c0_i32_1 : i32, i32, i32
  }
  func.func @transform_12(%arg0: i32) -> (i32, i32, i32) {
    %c0_i32 = arith.constant 0 : i32
    %c0_i32_0 = arith.constant 0 : i32
    %c0_i32_1 = arith.constant 0 : i32
    %c0_i32_2 = arith.constant 0 : i32
    return %c0_i32, %c0_i32_0, %c0_i32_1 : i32, i32, i32
  }
  func.func @transform_13(%arg0: i32) -> (i32, i32) {
    %c0_i32 = arith.constant 0 : i32
    %c0_i32_0 = arith.constant 0 : i32
    %c0_i32_1 = arith.constant 0 : i32
    return %c0_i32, %c0_i32_0 : i32, i32
  }
  func.func @transform_14(%arg0: i32) -> (i32, i32) {
    %c0_i32 = arith.constant 0 : i32
    %c0_i32_0 = arith.constant 0 : i32
    %c0_i32_1 = arith.constant 0 : i32
    return %c0_i32, %c0_i32_0 : i32, i32
  }
  func.func @transform_15(%arg0: i32) -> (i32, i32) {
    %c0_i32 = arith.constant 0 : i32
    %c0_i32_0 = arith.constant 0 : i32
    %c0_i32_1 = arith.constant 0 : i32
    return %c0_i32, %c0_i32_0 : i32, i32
  }
  func.func @transform_16(%arg0: i32) -> (i32, i32) {
    %c0_i32 = arith.constant 0 : i32
    %c0_i32_0 = arith.constant 0 : i32
    %c0_i32_1 = arith.constant 0 : i32
    return %c0_i32, %c0_i32_0 : i32, i32
  }
  func.func @transform_17(%arg0: i32) -> (i32, i32) {
    %c0_i32 = arith.constant 0 : i32
    %c0_i32_0 = arith.constant 0 : i32
    %c0_i32_1 = arith.constant 0 : i32
    return %c0_i32, %c0_i32_0 : i32, i32
  }
  func.func @transform_18(%arg0: i32) -> (i32, i32) {
    %c0_i32 = arith.constant 0 : i32
    %c0_i32_0 = arith.constant 0 : i32
    %c0_i32_1 = arith.constant 0 : i32
    return %c0_i32, %c0_i32_0 : i32, i32
  }
  func.func @transform_19(%arg0: i32) -> (i32, i32, i32) {
    %c0_i32 = arith.constant 0 : i32
    %c0_i32_0 = arith.constant 0 : i32
    %c0_i32_1 = arith.constant 0 : i32
    return %arg0, %c0_i32, %c0_i32_0 : i32, i32, i32
  }
  func.func @transform_20(%arg0: i32) -> (i32, i32, i32) {
    %c0_i32 = arith.constant 0 : i32
    %c0_i32_0 = arith.constant 0 : i32
    %c0_i32_1 = arith.constant 0 : i32
    return %arg0, %c0_i32, %c0_i32_0 : i32, i32, i32
  }
}

</mosaic_0001>

<bundles_post_ra>
// kernel: tpu_custom_call.1
= control target key start
LH: loop header
LB: loop body
LE: loop exit
PB: predicated region body
PF: predicated region fallthrough
CT: control target
= control target key end

     0   :  { %s5545_s0 = inlined_call_operand.hbm [shape: f32[4,8,13], index: 0, kind: input, shape index: {}]   ;;  %s5546_s1 = inlined_call_operand.hbm [shape: f32[4,16,16], index: 1, kind: input, shape index: {}]   ;;  %s5547_s2 = inlined_call_operand.vmem [shape: f32[4,16,8], index: 2, kind: input, shape index: {}]   ;;  %s5548_s3 = inlined_call_operand.vmem [shape: f32[4,32,64], index: 3, kind: input, shape index: {}]   ;;  %s5549_s4 = inlined_call_operand.vmem [shape: f32[4,8,1], index: 4, kind: input, shape index: {}]   ;;  %s5550_s5 = inlined_call_operand.hbm [shape: f32[13,32], index: 5, kind: input, shape index: {}]   ;;  %s5551_s6 = inlined_call_operand.hbm [shape: f32[1,32], index: 6, kind: input, shape index: {}]   ;;  %s5552_s7 = inlined_call_operand.vmem [shape: f32[3,32,128], index: 7, kind: input, shape index: {}]   ;;  %s5553_s8 = inlined_call_operand.vmem [shape: f32[3,1,128], index: 8, kind: input, shape index: {}]   ;;  %s5554_s9 = inlined_call_operand.hbm [shape: f32[3,16,64], index: 9, kind: input, shape index: {}]   ;;  %s5555_s10 = inlined_call_operand.hbm [shape: f32[3,1,64], index: 10, kind: input, shape index: {}]   ;;  %s5556_s11 = inlined_call_operand.hbm [shape: f32[2,1,32], index: 11, kind: input, shape index: {}]   ;;  %s5557_s12 = inlined_call_operand.hbm [shape: f32[2,1,32], index: 12, kind: input, shape index: {}]   ;;  %s5558_s13 = inlined_call_operand.vmem [shape: f32[32,2], index: 13, kind: input, shape index: {}]   ;;  %s5559_s14 = inlined_call_operand.hbm [shape: f32[1,2], index: 14, kind: input, shape index: {}]   ;;  %s5560_s15 = inlined_call_operand.vmem [shape: f32[32,32], index: 15, kind: input, shape index: {}]   ;;  %s5561_s16 = inlined_call_operand.vmem [shape: f32[1,32], index: 16, kind: input, shape index: {}]   ;;  %s5562_s17 = inlined_call_operand.vmem [shape: f32[32,1], index: 17, kind: input, shape index: {}]   ;;  %s5563_s18 = inlined_call_operand.<no memory space> [shape: f32[1,1], index: 18, kind: input, shape index: {}]   ;;  %s5564_s19 = inlined_call_operand.vmem [shape: f32[4,8,2], index: 19, kind: output, shape index: {0}]   ;;  %s5565_s20 = inlined_call_operand.vmem [shape: f32[4,1,1], index: 20, kind: output, shape index: {1}]  }
   0x1   :  { %5579 = sst [smem:[#allocation24_spill]] %s5545_s0  ;;  %v26_v0 = vstv %s5563_s18 }
   0x2   :  { %5580 = sst [smem:[#allocation25_spill]] %s5546_s1  ;;  %27 = vst [vmem:[#allocation3] sm:$0x1] %v26_v0 }
   0x3   :  { %5581 = sst [smem:[#allocation26_spill]] %s5547_s2 }
   0x4   :  { %5582 = sst [smem:[#allocation27_spill]] %s5548_s3 }
   0x5   :  { %5583 = sst [smem:[#allocation28_spill]] %s5549_s4 }
   0x6   :  { %5584 = sst [smem:[#allocation29_spill]] %s5550_s5 }
   0x7   :  { %5585 = sst [smem:[#allocation30_spill]] %s5551_s6 }
   0x8   :  { %5586 = sst [smem:[#allocation31_spill]] %s5554_s9 }
   0x9   :  { %5587 = sst [smem:[#allocation32_spill]] %s5555_s10 }
   0xa   :  { %5588 = sst [smem:[#allocation33_spill]] %s5558_s13 }
   0xb   :  { %5589 = sst [smem:[#allocation34_spill]] %s5560_s15 }
   0xc   :  { %5590 = sst [smem:[#allocation35_spill]] %s5561_s16 }
   0xd   :  { %5591 = sst [smem:[#allocation36_spill]] %s5562_s17 }
   0xe   :  { %5592 = sst [smem:[#allocation37_spill]] %s5564_s19 }
   0xf   :  { %5593 = sst [smem:[#allocation38_spill]] %s5565_s20 }
  0x10   :  { %28 = vsyncpa [#allocation5], 0 }
  0x11   :  { %30 = vsyncpa [#allocation5 + $0x1], 0 }
  0x12   :  { %31 = vsyncpa [#allocation7], 0 }
  0x13   :  { %33 = vsyncpa [#allocation7 + $0x1], 0 }
  0x14   :  { %34 = vsyncpa [#allocation10], 0 }
  0x15   :  { %35 = vsyncpa [#allocation13], 0 }
  0x16   :  { %36 = vsyncpa [#allocation16], 0  ;;  %s4718_s23 = smov 0   ;;  %s4720_s24 = smov 0  }
  0x17   :  { %s4722_s2 = smov 0   ;;  %s4724_s25 = smov 0  }
  0x18 LB: > { %s4584_s18 = smov [#allocation8]   ;;  %s4739_s26 = sadd.s32 4294967295, %s4582_s25   ;;  %s4582_s25 = sphi %s4724_s25, %s5633_s25   ;;  %s4578_s2 = sphi %s4722_s2, %s5632_s2   ;;  %s4574_s24 = sphi %s4720_s24, %s5631_s24   ;;  %s4570_s23 = sphi %s4718_s23, %s5630_s23  }
  0x19   : > { %s535_s3 = sshll.u32 %s4584_s18, 4  ;;  %p3301_p0 = scmp.ge.s32.totalorder %s4582_s25, 1  ;;  %s4744_s3 = int_to_ptr.vmem [resolvable:$true] %s535_s3 }
  0x1a   : > { %p5575_p1 = scmp.eq.s32.totalorder %s4739_s26, 0  ;;  %p523_p2 = scmp.lt.s32.totalorder %s4582_s25, 5 }
  0x1b   : > { %s4585_s28 = smov [#allocation9]   ;;  %s4586_s30 = smov [#allocation12]  }
  0x1c   : > { %p4746_p3 = pnand %p3301_p0, %p523_p2  ;;  %s549_s4 = sshll.u32 %s4585_s28, 4  ;;  %s4758_s4 = int_to_ptr.vmem [resolvable:$true] %s549_s4 }
  0x1d   : > { %s578_s0 = sshll.u32 %s4586_s30, 4  ;;  %s5596_s5 = sld [smem:[#allocation29_spill]]  ;;  %s4760_s0 = int_to_ptr.vmem [resolvable:$true] %s578_s0 }
  0x1e   : > { %s5594_s27 = scalar_select %p4746_p3, 1, 0 }
  0x1f   : > { %p4009_p4 = pneg %p4746_p3 }
  0x21   : > { %p4754_p5 = pnand %p4009_p4, %p5575_p1 }
  0x23   : > { %s4272_s22 = scalar_lea.hbm %s5596_s5, 256  ;;  %p4770_p7 = pneg %p4754_p5 }
  0x24   : > { %p4273_p6 = scmp.ne.s32.totalorder %s5596_s5, %s4272_s22  ;;  %p4279_p10 = scmp.lt.u32.totalorder %s4272_s22, %s5596_s5 }
  0x26   : > { %p4275_p8 = pnand %p4770_p7, %p4273_p6 }
  0x28   : > { %p4276_p9 = pneg %p4275_p8 }
  0x2a   : > { %p4281_p11 = pnand %p4279_p10, %p4276_p9 }
  0x2c   : > { %4284 = shalt.err (!%p4281_p11)
}
  0x2d   : > { %s4285_s20 = scalar_lea.vmem %s4744_s3, 256  ;;  %p4293_p2 = scmp.lt.s32.totalorder %s4744_s3, %s4744_s3 }
  0x2e   : > { %p4286_p12 = scmp.ne.s32.totalorder %s4744_s3, %s4285_s20  ;;  %p4294_p4 = scmp.lt.s32.totalorder %s4285_s20, %s4285_s20 }
  0x30   : > { %p4288_p13 = pnand %p4286_p12, %p4770_p7  ;;  %p4295_p6 = por %p4294_p4, %p4293_p2 }
  0x32   : > { %p4289_p0 = pneg %p4288_p13 }
  0x34   : > { %p4296_p8 = pnand %p4295_p6, %p4289_p0 }
  0x36   : > { %4299 = shalt.err (!%p4296_p8)
}
  0x37   : > { %s5571_s21 = smov 128   ;;  %s5573_s16 = smov 8  }
  0x38   : > { %4012 = dma.hbm_to_vmem [thread:$0]  (!%p4754_p5), %s5596_s5, 256, %s4744_s3, [#allocation7], %s5571_s21, %s5571_s21, %s5573_s16  }
  0x39   : > { %s5598_s6 = sld [smem:[#allocation30_spill]] }
  0x3f   : > { %s4300_s20 = scalar_lea.hbm %s5598_s6, 16 }
  0x40   : > { %p4301_p9 = scmp.ne.s32.totalorder %s5598_s6, %s4300_s20  ;;  %p4307_p12 = scmp.lt.u32.totalorder %s4300_s20, %s5598_s6 }
  0x42   : > { %p4303_p10 = pnand %p4301_p9, %p4770_p7 }
  0x44   : > { %p4304_p11 = pneg %p4303_p10 }
  0x46   : > { %p4309_p13 = pnand %p4307_p12, %p4304_p11 }
  0x48   : > { %4312 = shalt.err (!%p4309_p13)
}
  0x49   : > { %s4313_s3 = scalar_lea.vmem %s4758_s4, 16  ;;  %s4320_s17 = scalar_lea.vmem %s4758_s4, 32 }
  0x4a   : > { %p4314_p0 = scmp.ne.s32.totalorder %s4758_s4, %s4313_s3  ;;  %p4321_p6 = scmp.lt.s32.totalorder %s4758_s4, %s4758_s4 }
  0x4b   : > { %p4322_p8 = scmp.lt.s32.totalorder %s4320_s17, %s4313_s3 }
  0x4c   : > { %p4316_p2 = pnand %p4314_p0, %p4770_p7 }
  0x4d   : > { %p4323_p9 = por %p4322_p8, %p4321_p6 }
  0x4e   : > { %p4317_p4 = pneg %p4316_p2 }
  0x50   : > { %p4324_p10 = pnand %p4323_p9, %p4317_p4 }
  0x52   : > { %4327 = shalt.err (!%p4324_p10)
}
  0x53   : > { %4015 = dma.hbm_to_vmem [thread:$0]  (!%p4754_p5), %s5598_s6, 16, %s4758_s4, [#allocation10]  }
  0x54   : > { %s5599_s10 = sld [smem:[#allocation32_spill]] }
  0x5a   : > { %s4328_s22 = scalar_lea.hbm %s5599_s10, 48 }
  0x5b   : > { %p4329_p11 = scmp.ne.s32.totalorder %s5599_s10, %s4328_s22  ;;  %p4335_p0 = scmp.lt.u32.totalorder %s4328_s22, %s5599_s10 }
  0x5d   : > { %p4331_p12 = pnand %p4329_p11, %p4770_p7 }
  0x5f   : > { %p4332_p13 = pneg %p4331_p12 }
  0x61   : > { %p4337_p2 = pnand %p4335_p0, %p4332_p13 }
  0x63   : > { %4340 = shalt.err (!%p4337_p2)
}
  0x64   : > { %s4341_s4 = scalar_lea.vmem %s4760_s0, 48  ;;  %s4348_s17 = scalar_lea.vmem %s4760_s0, 64 }
  0x65   : > { %p4342_p4 = scmp.ne.s32.totalorder %s4760_s0, %s4341_s4  ;;  %p4349_p9 = scmp.lt.s32.totalorder %s4760_s0, %s4760_s0 }
  0x66   : > { %p4350_p10 = scmp.lt.s32.totalorder %s4348_s17, %s4341_s4 }
  0x67   : > { %p4344_p6 = pnand %p4342_p4, %p4770_p7 }
  0x68   : > { %p4351_p11 = por %p4350_p10, %p4349_p9 }
  0x69   : > { %p4345_p8 = pneg %p4344_p6 }
  0x6b   : > { %p4352_p12 = pnand %p4351_p11, %p4345_p8 }
  0x6d   : > { %4355 = shalt.err (!%p4352_p12)
}
  0x6e   : > { %s5577_s13 = smov 16   ;;  %s4590_s15 = smov 1  }
  0x6f   : > { %4021 = dma.hbm_to_vmem [thread:$0]  (!%p4754_p5), %s5599_s10, 48, %s4760_s0, [#allocation13], %s5577_s13, %s5577_s13, %s4590_s15  }
  0x70   : > { %s4591_s22 = smov [#allocation15]   ;;  %s4592_s30 = smov [#allocation11]  }
  0x71   : > { %s604_s18 = sshll.u32 %s4591_s22, 4  ;;  %s565_s20 = sshll.u32 %s4592_s30, 4  ;;  %s605_s18 = int_to_ptr.vmem [resolvable:$true] %s604_s18  ;;  %s566_s20 = int_to_ptr.vmem [resolvable:$true] %s565_s20 }
  0x72   : > { %s4356_s17 = scalar_lea.hbm %s5557_s12, 32 }
  0x73   : > { %p4357_p13 = scmp.ne.s32.totalorder %s5557_s12, %s4356_s17  ;;  %p4363_p4 = scmp.lt.u32.totalorder %s4356_s17, %s5557_s12 }
  0x75   : > { %p4359_p0 = pnand %p4357_p13, %p4770_p7 }
  0x77   : > { %p4360_p2 = pneg %p4359_p0 }
  0x79   : > { %p4365_p6 = pnand %p4363_p4, %p4360_p2 }
  0x7b   : > { %4368 = shalt.err (!%p4365_p6)
}
  0x7c   : > { %s4369_s0 = scalar_lea.vmem %s605_s18, 32  ;;  %p4377_p11 = scmp.lt.s32.totalorder %s605_s18, %s605_s18 }
  0x7d   : > { %p4370_p8 = scmp.ne.s32.totalorder %s605_s18, %s4369_s0  ;;  %p4378_p12 = scmp.lt.s32.totalorder %s4369_s0, %s4369_s0 }
  0x7f   : > { %p4372_p9 = pnand %p4370_p8, %p4770_p7  ;;  %p4379_p1 = por %p4378_p12, %p4377_p11 }
  0x81   : > { %p4373_p10 = pneg %p4372_p9 }
  0x83   : > { %p4380_p3 = pnand %p4379_p1, %p4373_p10 }
  0x85   : > { %4383 = shalt.err (!%p4380_p3)
}
  0x86   : > { %4027 = dma.hbm_to_vmem [thread:$0]  (!%p4754_p5), %s5557_s12, 32, %s605_s18, [#allocation16], %s5577_s13, %s5577_s13, %s4590_s15  }
  0x87   : > { %s5600_s9 = sld [smem:[#allocation31_spill]] }
  0x8d   : > { %s4384_s19 = scalar_lea.hbm %s5600_s9, 768 }
  0x8e   : > { %p4385_p1 = scmp.ne.s32.totalorder %s5600_s9, %s4384_s19  ;;  %p4391_p0 = scmp.lt.u32.totalorder %s4384_s19, %s5600_s9 }
  0x90   : > { %p4387_p3 = pnand %p4385_p1, %p4770_p7 }
  0x92   : > { %p4388_p13 = pneg %p4387_p3 }
  0x94   : > { %p4393_p2 = pnand %p4391_p0, %p4388_p13 }
  0x96   : > { %4396 = shalt.err (!%p4393_p2)
}
  0x97   : > { %s4397_s4 = scalar_lea.vmem %s566_s20, 768  ;;  %p4405_p9 = scmp.lt.s32.totalorder %s566_s20, %s566_s20 }
  0x98   : > { %p4398_p4 = scmp.ne.s32.totalorder %s566_s20, %s4397_s4  ;;  %p4406_p10 = scmp.lt.s32.totalorder %s4397_s4, %s4397_s4 }
  0x9a   : > { %p4400_p6 = pnand %p4398_p4, %p4770_p7  ;;  %p4407_p11 = por %p4406_p10, %p4405_p9 }
  0x9c   : > { %p4401_p8 = pneg %p4400_p6 }
  0x9e   : > { %p4408_p12 = pnand %p4407_p11, %p4401_p8 }
  0xa0   : > { %4411 = shalt.err (!%p4408_p12)
}
  0xa1   : > { %s5601_s18 = smov 8   ;;  %s5602_s17 = smov 128  }
  0xa2   : > { %4018 = dma.hbm_to_vmem [thread:$0]  (!%p4754_p5), %s5600_s9, 768, %s566_s20, [#allocation10], %s5602_s17, %s5602_s17, %s5601_s18  }
  0xa3   : > { %s4593_s6 = smov [#allocation14]   ;;  %s4594_s16 = smov [#allocation17]  }
  0xa4   : > { %s591_s21 = sshll.u32 %s4593_s6, 4  ;;  %s621_s19 = sshll.u32 %s4594_s16, 4  ;;  %s592_s21 = int_to_ptr.vmem [resolvable:$true] %s591_s21  ;;  %s622_s19 = int_to_ptr.vmem [resolvable:$true] %s621_s19 }
  0xa5   : > { %s4412_s30 = scalar_lea.hbm %s5556_s11, 32 }
  0xa6   : > { %p4413_p1 = scmp.ne.s32.totalorder %s5556_s11, %s4412_s30  ;;  %p4419_p0 = scmp.lt.u32.totalorder %s4412_s30, %s5556_s11 }
  0xa8   : > { %p4415_p3 = pnand %p4413_p1, %p4770_p7 }
  0xaa   : > { %p4416_p13 = pneg %p4415_p3 }
  0xac   : > { %p4421_p2 = pnand %p4419_p0, %p4416_p13 }
  0xae   : > { %4424 = shalt.err (!%p4421_p2)
}
  0xaf   : > { %s4425_s20 = scalar_lea.vmem %s592_s21, 32  ;;  %p4433_p9 = scmp.lt.s32.totalorder %s592_s21, %s592_s21 }
  0xb0   : > { %p4426_p4 = scmp.ne.s32.totalorder %s592_s21, %s4425_s20  ;;  %p4434_p10 = scmp.lt.s32.totalorder %s4425_s20, %s4425_s20 }
  0xb2   : > { %p4428_p6 = pnand %p4426_p4, %p4770_p7  ;;  %p4435_p11 = por %p4434_p10, %p4433_p9 }
  0xb4   : > { %p4429_p8 = pneg %p4428_p6 }
  0xb6   : > { %p4436_p12 = pnand %p4435_p11, %p4429_p8 }
  0xb8   : > { %4439 = shalt.err (!%p4436_p12)
}
  0xb9   : > { %s5603_s5 = smov 16   ;;  %s4440_s22 = scalar_lea.hbm %s5559_s14, 16 }
  0xba   : > { %4024 = dma.hbm_to_vmem [thread:$0]  (!%p4754_p5), %s5556_s11, 32, %s592_s21, [#allocation13], %s5603_s5, %s5603_s5, %s4590_s15  }
  0xbb   : > { %p4441_p1 = scmp.ne.s32.totalorder %s5559_s14, %s4440_s22  ;;  %p4447_p0 = scmp.lt.u32.totalorder %s4440_s22, %s5559_s14 }
  0xbd   : > { %p4443_p3 = pnand %p4441_p1, %p4770_p7 }
  0xbf   : > { %p4444_p13 = pneg %p4443_p3 }
  0xc1   : > { %p4449_p2 = pnand %p4447_p0, %p4444_p13 }
  0xc3   : > { %4452 = shalt.err (!%p4449_p2)
}
  0xc4   : > { %s4453_s20 = scalar_lea.vmem %s622_s19, 16  ;;  %s4460_s15 = scalar_lea.vmem %s622_s19, 32 }
  0xc5   : > { %p4454_p4 = scmp.ne.s32.totalorder %s622_s19, %s4453_s20  ;;  %p4461_p9 = scmp.lt.s32.totalorder %s622_s19, %s622_s19 }
  0xc6   : > { %p4462_p10 = scmp.lt.s32.totalorder %s4460_s15, %s4453_s20 }
  0xc7   : > { %p4456_p6 = pnand %p4454_p4, %p4770_p7 }
  0xc8   : > { %p4463_p11 = por %p4462_p10, %p4461_p9 }
  0xc9   : > { %p4457_p8 = pneg %p4456_p6 }
  0xcb   : > { %p4464_p12 = pnand %p4463_p11, %p4457_p8 }
  0xcd   : > { %4467 = shalt.err (!%p4464_p12)
}
  0xce   : > { %4030 = dma.hbm_to_vmem [thread:$0]  (!%p4754_p5), %s5559_s14, 16, %s622_s19, [#allocation16]  }
  0xcf   : > { %s4927_s28 = sadd.s32 1, %s4582_s25   ;;  %s49_s13 = sadd.s32 1, %s4578_s2 }
  0xd0   : > { %s46_s29 = ssub.s32 %s4582_s25, %s4927_s28  ;;  %p56_p1 = scmp.ne.s32.totalorder %s4578_s2, %s4574_s24 }
  0xd1   : > { %p47_p7 = scmp.eq.s32.totalorder %s46_s29, 0  ;;  %p57_p3 = scmp.eq.s32.totalorder %s4582_s25, 0 }
  0xd2   : > { %p62_p13 = scmp.ne.s32.totalorder %s4574_s24, %s4570_s23  ;;  %p5604_p2 = scmp.eq.s32.totalorder %s4739_s26, 0 }
  0xd3   : > { %s4938_s6 = scalar_select %p47_p7, %s4578_s2, %s49_s13  }
  0xd4   : > { %p58_p0 = por %p57_p3, %p56_p1  ;;  %p4942_p4 = por %p5604_p2, %p62_p13 }
  0xd5   : > { %p4045_p6 = scmp.lt.s32.totalorder %s4582_s25, 4  ;;  %s4948_s19 = sand.u32 1, %s4578_s2  }
  0xd6   : > { %s3310_s1 = sshll.u32 %s4948_s19, 3  ;;  %s3311_s22 = sshll.u32 %s4582_s25, 7 }
  0xd7   : > { %s5606_s4 = sld [smem:[#allocation24_spill]]  ;;  %s648_s0 = scalar_lea.vmem [#allocation4], %s3310_s1 }
  0xd8   : > { %s655_s20 = sshll.u32 %s648_s0, 4  ;;  %p4959_p5 = pnand %p4045_p6, %p58_p0  ;;  %s4957_s20 = int_to_ptr.vmem [resolvable:$true] %s655_s20 }
  0xd9   : > { %s3312_s21 = sshll.u32 %s4948_s19, 4  ;;  %s645_s29 = scalar_lea.sflag [#allocation5], %s4948_s19 }
  0xda   : > { %p4470_p9 = pneg %p4959_p5 }
  0xdd   : > { %s4955_s23 = scalar_lea.hbm %s5606_s4, %s3311_s22  ;;  %s4473_s30 = scalar_lea.hbm %s5606_s4, 512 }
  0xde   : > { %s4468_s13 = scalar_lea.hbm %s4955_s23, 128  ;;  %p4474_p12 = scmp.lt.u32.totalorder %s4955_s23, %s5606_s4 }
  0xdf   : > { %p4469_p8 = scmp.ne.s32.totalorder %s4955_s23, %s4468_s13  ;;  %p4475_p7 = scmp.lt.u32.totalorder %s4473_s30, %s4468_s13 }
  0xe0   : > { %p4477_p3 = scmp.lt.u32.totalorder %s4468_s13, %s4955_s23 }
  0xe1   : > { %p4471_p10 = pnand %p4470_p9, %p4469_p8  ;;  %p4476_p1 = por %p4475_p7, %p4474_p12 }
  0xe3   : > { %p4472_p11 = pneg %p4471_p10  ;;  %p4478_p13 = por %p4477_p3, %p4476_p1 }
  0xe5   : > { %p4479_p0 = pnand %p4478_p13, %p4472_p11 }
  0xe7   : > { %4482 = shalt.err (!%p4479_p0)
}
  0xe8   : > { %s4483_s5 = scalar_lea.vmem %s4957_s20, 128  ;;  %s4595_s1 = smov [#allocation4]  }
  0xe9   : > { %p4484_p2 = scmp.ne.s32.totalorder %s4957_s20, %s4483_s5  ;;  %s4488_s22 = sshll.u32 %s4595_s1, 4  ;;  %s4489_s22 = int_to_ptr.vmem [resolvable:$false] %s4488_s22 }
  0xea   : > { %s4490_s3 = scalar_lea.vmem %s4489_s22, 256  ;;  %p4491_p10 = scmp.lt.s32.totalorder %s4957_s20, %s4489_s22 }
  0xeb   : > { %p4486_p6 = pnand %p4484_p2, %p4470_p9  ;;  %p4492_p12 = scmp.lt.s32.totalorder %s4490_s3, %s4483_s5 }
  0xed   : > { %p4487_p8 = pneg %p4486_p6  ;;  %p4493_p7 = por %p4492_p12, %p4491_p10 }
  0xef   : > { %p4494_p1 = pnand %p4493_p7, %p4487_p8 }
  0xf1   : > { %4497 = shalt.err (!%p4494_p1)
}
  0xf2   : > { %4034 = dma.hbm_to_vmem [thread:$0]  (!%p4959_p5), %s4955_s23, 128, %s4957_s20, %s645_s29  }
  0xf3   : > { %s666_s13 = scalar_lea.vmem [#allocation6], %s3312_s21  ;;  %s3423_s0 = sshll.u32 %s4582_s25, 8 }
  0xf4   : > { %s673_s30 = sshll.u32 %s666_s13, 4  ;;  %s5608_s22 = sld [smem:[#allocation25_spill]]  ;;  %s4993_s30 = int_to_ptr.vmem [resolvable:$true] %s673_s30 }
  0xf5   : > { %s5609_s4 = sand.u32 1, %s4582_s25  }
  0xf6   : > { %s5003_s9 = scalar_lea.sflag [#allocation7], %s5609_s4 }
  0xfa   : > { %s4999_s3 = scalar_lea.hbm %s5608_s22, %s3423_s0  ;;  %s4503_s20 = scalar_lea.hbm %s5608_s22, 1024 }
  0xfb   : > { %s4498_s10 = scalar_lea.hbm %s4999_s3, 256  ;;  %p4504_p0 = scmp.lt.u32.totalorder %s4999_s3, %s5608_s22 }
  0xfc   : > { %p4499_p11 = scmp.ne.s32.totalorder %s4999_s3, %s4498_s10  ;;  %p4505_p2 = scmp.lt.u32.totalorder %s4503_s20, %s4498_s10 }
  0xfd   : > { %p4507_p8 = scmp.lt.u32.totalorder %s4498_s10, %s4999_s3 }
  0xfe   : > { %p4501_p3 = pnand %p4499_p11, %p4470_p9  ;;  %p4506_p6 = por %p4505_p2, %p4504_p0 }
 0x100   : > { %p4502_p13 = pneg %p4501_p3  ;;  %p4508_p10 = por %p4507_p8, %p4506_p6 }
 0x102   : > { %p4509_p12 = pnand %p4508_p10, %p4502_p13 }
 0x104   : > { %4512 = shalt.err (!%p4509_p12)
}
 0x105   : > { %s4513_s25 = scalar_lea.vmem %s4993_s30, 256  ;;  %s4596_s4 = smov [#allocation6]  }
 0x106   : > { %p4514_p7 = scmp.ne.s32.totalorder %s4993_s30, %s4513_s25  ;;  %s4518_s13 = sshll.u32 %s4596_s4, 4  ;;  %s4519_s13 = int_to_ptr.vmem [resolvable:$false] %s4518_s13 }
 0x107   : > { %s4520_s0 = scalar_lea.vmem %s4519_s13, 512  ;;  %p4521_p3 = scmp.lt.s32.totalorder %s4993_s30, %s4519_s13 }
 0x108   : > { %p4516_p1 = pnand %p4514_p7, %p4470_p9  ;;  %p4522_p0 = scmp.lt.s32.totalorder %s4520_s0, %s4513_s25 }
 0x10a   : > { %p4517_p11 = pneg %p4516_p1  ;;  %p4523_p2 = por %p4522_p0, %p4521_p3 }
 0x10c   : > { %p4524_p6 = pnand %p4523_p2, %p4517_p11 }
 0x10e   : > { %4527 = shalt.err (!%p4524_p6)
}
 0x10f   : > { %4037 = dma.hbm_to_vmem [thread:$0]  (!%p4959_p5), %s4999_s3, 256, %s4993_s30, %s5003_s9, %s5602_s17, %s5602_s17, %s5601_s18  }
 0x110   : > { %p5610_p9 = scmp.ne.s32.totalorder %s5594_s27, 0 }
 0x111   : > { %s710_s10 = sand.u32 (!%p5610_p9), 1, %s4574_s24  }
 0x112   : > { %708 = sbr.rel (%p5610_p9) target bundleno = 6385 (0x18f1), region = 96  ;;  %s3316_s1 = sshll.u32 (!%p5610_p9), %s710_s10, 3 }
 0x113   : > { %s711_s5 = scalar_lea.sflag (!%p5610_p9), [#allocation5], %s710_s10  ;;  %s5035_s19 = scalar_lea.vmem (!%p5610_p9), [#allocation4], %s3316_s1 }
 0x119   : > { %4545 = dma.done.wait (%p4942_p4), %s711_s5, 128  }
 0x11a   : > { %4547 = vsyncadd (%p4942_p4), %s711_s5, 4294967168  ;;  %s719_s15 = sand.u32 1, %s4739_s26   ;;  %s3317_s23 = sshll.u32 %s710_s10, 4 }
 0x11b   : > { %s720_s9 = scalar_lea.sflag [#allocation7], %s719_s15  ;;  %s5042_s18 = scalar_lea.vmem [#allocation6], %s3317_s23 }
 0x11c   : > { %4549 = dma.done.wait (%p4942_p4), %s720_s9, 256  }
 0x11d   : > { %4551 = vsyncadd (%p4942_p4), %s720_s9, 4294967040  ;;  %p5611_p5 = scmp.eq.s32.totalorder %s4739_s26, 0 }
 0x11f   : > { %4553 = dma.done.wait (%p5611_p5), [#allocation7], 256   ;;  %p5612_p13 = pmov %p5611_p5 }
 0x120   : > { %p5613_p8 = pmov %p5611_p5 }
 0x121   : > { %4555 = vsyncadd (%p5612_p13), [#allocation7], 4294967040 }
 0x122   : > { %4557 = dma.done.wait (%p5613_p8), [#allocation10], 784   ;;  %p5614_p10 = pmov %p5611_p5 }
 0x123   : > { %p5615_p12 = pmov %p5611_p5 }
 0x124   : > { %4559 = vsyncadd (%p5614_p10), [#allocation10], 4294966512 }
 0x125   : > { %4561 = dma.done.wait (%p5615_p12), [#allocation13], 80   ;;  %p5616_p7 = pmov %p5611_p5 }
 0x126   : > { %p5617_p4 = pmov %p5611_p5 }
 0x127   : > { %4563 = vsyncadd (%p5616_p7), [#allocation13], 4294967216 }
 0x128   : > { %4565 = dma.done.wait (%p5617_p4), [#allocation16], 48   ;;  %p5618_p1 = pmov %p5617_p4 }
 0x129   : > { %v4597_v1 = vmov 0.0|0.0   ;;  %vm4598_vm0 = vmmov 0   ;;  %v4599_v2 = vmov 0.0   ;;  %vm864_vm1 = vcmask 1044480   ;;  %v851_v3 = vld [vmem:[#allocation8] sm:$0xff]  ;;  %v951_v7 = vld [vmem:[%s5552_s7 + $0x8] sm:$0xff] }
 0x12a   : > { %4567 = vsyncadd (%p5618_p1), [#allocation16], 4294967248  ;;  %3793 = vmatprep.subr.bf16.mxu0 %v4597_v1  ;;  %3797 = vmatprep.subr.bf16.mxu1 %v4597_v1  ;;  %v852_v4 = vld [vmem:[#allocation8 + $0x8] sm:$0x1f]  ;;  %vm4600_vm2 = vmmov 1   ;;  %v850_v9 = vld [vmem:[%s5035_s19] sm:$0xff] }
 0x12b   : > { %3556 = vmatprep.mubr.msk.f32.mxu0 %vm4598_vm0, %v4599_v2  ;;  %3567 = vmatprep.mubr.msk.f32.mxu1 %vm4598_vm0, %v4599_v2  ;;  %vm3795_vm3 = vmpackc.low %vm864_vm1, %vm4600_vm2  ;;  %v3794_v5 = vpack.c.bf16 %v852_v4, %v851_v3  ;;  %v950_v6 = vld [vmem:[%s5552_s7] sm:$0xff]  ;;  %vm860_vm4 = vcmask 105472   ;;  %v952_v10 = vld [vmem:[%s5552_s7 + $0x10] sm:$0xff]  ;;  %vm961_vm5 = vcmask 261120   ;;  %vm1044_vm6 = vcmask 130048   ;;  %p829_p11 = scmp.lt.s32.totalorder %s4739_s26, 3 }
 0x12c   : > { %v3798_v8 = vpack.c.bf16 %v951_v7, %v950_v6  ;;  %v953_v11 = vld [vmem:[%s5552_s7 + $0x18] sm:$0xff]  ;;  %v3331_v13 = vld [vmem:[#allocation9] ss:$0 sm:$0xff]  ;;  %v1035_v17 = vld [vmem:[#allocation11] sm:$0xff]  ;;  %s5619_s0 = sld [smem:[#allocation26_spill]]  ;;  %vm1130_vm7 = vcmask 64512  }
 0x12d   : > { %3796 = vmatpush3.bf16.msk.msra.mxu0 %vm3795_vm3, %v3794_v5  ;;  %v3801_v12 = vpack.c.bf16 %v953_v11, %v952_v10  ;;  %v1036_v18 = vld [vmem:[#allocation11 + $0x8] sm:$0xff]  ;;  %s5635_s26 = smov (!%p829_p11, %s4739_s26), 3  ;;  %v3334_v23 = vld [vmem:[%s5553_s8] ss:$0 sm:$0xff]  ;;  %s4601_s19 = smov 96   ;;  %vm5124_vm8 = vmpackc.low %vm1130_vm7, %vm1130_vm7  ;;  %vm1349_vm10 = vcmask 523264  }
 0x12e   : > { %3799 = vmatpush3.bf16.msra.mxu1 %v3798_v8  ;;  %v5086_v19 = vld [vmem:[%s5042_s18] sm:$0xff]  ;;  %v3803_v20 = vpack.c.bf16 %v1036_v18, %v1035_v17  ;;  %v5091_v21 = vld [vmem:[%s5042_s18 + $0x8] sm:$0xff]  ;;  %s3424_s25 = sshll.u32 %s5635_s26, 4  ;;  %s4602_s15 = smov 112  }
 0x12f   : > { %3800 = vmatprep.subr.bf16.mxu1 %v4597_v1  ;;  %v3336_v29 = vld [vmem:[#allocation12] ss:$0 sm:$0xff]  ;;  %s4603_s23 = smov 120   ;;  %s4604_s9 = smov 104  }
 0x130   : > { %3557 = vmatmul.mubr.msk.f32.vlgmr.msra.gmra.mrb[0].mxu0 %vm860_vm4, %v850_v9  ;;  %3804 = vmatprep.subr.bf16.mxu0 %v3803_v20  ;;  %s3425_s18 = sshll.u32 %s5635_s26, 5  ;;  %s5622_s16 = sld [smem:[#allocation27_spill]] }
 0x131   : > { %3574 = vmatprep.mubr.msk.f32.mxu0 %vm1044_vm6, %v5086_v19  ;;  %3806 = vmatpush3.bf16.msra.mxu0 %v3803_v20  ;;  %s4605_s3 = smov 8   ;;  %s4606_s20 = smov 24  }
 0x132   : > { %3802 = vmatpush3.bf16.msra.mxu1 %v3801_v12  ;;  %s833_s10 = scalar_lea.vmem %s5619_s0, %s3424_s25  ;;  %s4607_s21 = smov 16  }
 0x133   : > { %v5103_v22 = vld [vmem:[%s833_s10] sm:$0xff]  ;;  %v5116_v28 = vld [vmem:[%s833_s10 + $0x8] sm:$0xff]  ;;  %s4608_s29 = smov 32   ;;  %s5627_s5 = sld [smem:[#allocation37_spill]] }
 0x134   : > { %3575 = vmatmul.mubr.msk.f32.vlgmr.msra.gmra.mrb[2].mxu0 %vm1044_vm6, %v5091_v21 }
 0x135   : > { %3579 = vmatprep.mubr.msk.f32.mxu0 %vm1130_vm7, %v5103_v22 }
 0x136   : > { %s838_s30 = scalar_lea.vmem %s5622_s16, %s3425_s18  ;;  %s5626_s16 = sld [smem:[#allocation36_spill]] }
 0x137   : > { %v5171_v52 = vld [vmem:[%s838_s30 + $0x8] sm:$0xff]  ;;  %v5173_v53 = vld [vmem:[%s838_s30] sm:$0xff]  ;;  %v5177_v57 = vld [vmem:[%s838_s30 + $0x18] sm:$0xff] }
 0x138   : > { %vm947_vm9 = vcmp.gt.f32.partialorder %v5171_v52, 0.0  ;;  %vm946_vm11 = vcmp.gt.f32.partialorder %v5173_v53, 0.0  ;;  %v5179_v59 = vld [vmem:[%s838_s30 + $0x10] sm:$0xff]  ;;  %vm949_vm12 = vcmp.gt.f32.partialorder %v5177_v57, 0.0  ;;  %s5624_s30 = sld [smem:[#allocation33_spill]] }
 0x139   : > { %vm948_vm13 = vcmp.gt.f32.partialorder %v5179_v59, 0.0 }
 0x203   : > { %v934_v14 = vpop.f32.mrb[0].mxu0 }
 0x204   : > { %v935_v15 = vadd.f32 %v3331_v13, %v934_v14  ;;  %v3558_v16 = vpop.f32.mrb[1].mxu0 }
 0x206   : > { %3568 = vmatmul.mubr.msk.f32.vlgmr.msra.gmra.mrb[0].mxu1 %vm961_vm5, %v935_v15 }
 0x2d9   : > { %v1031_v24 = vpop.f32.mrb[0].mxu1 }
 0x2da   : > { %v5110_v25 = vadd.f32 %v3334_v23, %v1031_v24  ;;  %v3569_v26 = vpop.f32.mrb[1].mxu1 }
 0x2dc   : > { %1127 = vrot.lane.b32.xlu0 %v5110_v25, %s4601_s19  ;;  %3598 = vmatprep.mubr.msk.f32.mxu1 %vm1130_vm7, %v5110_v25 }
 0x34e   : > { %v1128_v27 = vpop.permute.xlu0 %1127 }
 0x34f   : > { %3577 = vmatprep.subr.mxu0 %v1128_v27 }
 0x350   : > { %3578 = vmatpush3.msra.mxu0 %v1128_v27 }
 0x351   : > { %3580 = vmatmul.mubr.msk.f32.vlgmr.msra.gmra.mrb[2].mxu0 %vm1130_vm7, %v5116_v28 }
 0x424   : > { %v3581_v30 = vpop.f32.mrb[2].mxu0 }
 0x425   : > { %v3965_v31 = vadd.f32 %v3581_v30, %v3336_v29  ;;  %v1203_v32 = vpop.f32.mrb[3].mxu0 }
 0x426   : > { %v3966_v33 = vadd.f32 %v3336_v29, %v1203_v32 }
 0x428   : > { %v5120_v34 = vpack.i.bf16 %v3965_v31, %v3966_v33  ;;  %v3807_v35 = vpack.c.bf16 %v3965_v31, %v3966_v33 }
 0x42a   : > { %4115 = vrot.lane.b32.xlu1 %v5120_v34, %s4602_s15  ;;  %4110 = vrot.lane.b32.xlu0 %v5120_v34, %s4603_s23 }
 0x42b   : > { %3809 = vmatprep.subr.msk.bf16.mxu1 %vm5124_vm8, %v3807_v35 }
 0x42c   : > { %3812 = vmatpush3.bf16.xpose.msk.msra.mxu1 %vm5124_vm8, %v3807_v35 }
 0x42e   : > { %4120 = vrot.lane.b32.xlu1 %v5120_v34, %s4604_s9  ;;  %1212 = vrot.lane.b32.xlu0 %v5110_v25, %s4603_s23 }
 0x432   : > { %1214 = vrot.lane.b32.xlu1 %v5110_v25, %s4602_s15  ;;  %1216 = vrot.lane.b32.xlu0 %v5110_v25, %s4604_s9 }
 0x49c   : > { %v5144_v37 = vpop.permute.xlu1 %4115  ;;  %v4111_v38 = vpop.permute.xlu0 %4110 }
 0x49d   : > { %v4118_v39 = vunpack.i.h.bf16 %v5144_v37  ;;  %v4117_v40 = vunpack.i.l.bf16 %v5144_v37  ;;  %v4113_v41 = vunpack.i.h.bf16 %v4111_v38  ;;  %v4112_v42 = vunpack.i.l.bf16 %v4111_v38 }
 0x49f   : > { %v3813_v43 = vpack.c.bf16 %v4113_v41, %v4112_v42  ;;  %v3819_v45 = vpack.c.bf16 %v4118_v39, %v4117_v40 }
 0x4a0   : > { %v5148_v44 = vpop.permute.xlu1 %4120  ;;  %v1213_v49 = vpop.permute.xlu0 %1212 }
 0x4a1   : > { %v4123_v46 = vunpack.i.h.bf16 %v5148_v44  ;;  %v4122_v47 = vunpack.i.l.bf16 %v5148_v44  ;;  %3815 = vmatprep.subr.msk.bf16.mxu1 %vm5124_vm8, %v3813_v43 }
 0x4a2   : > { %3818 = vmatpush3.bf16.xpose.msk.msra.mxu1 %vm5124_vm8, %v3813_v43 }
 0x4a3   : > { %3821 = vmatprep.subr.msk.bf16.mxu1 %vm5124_vm8, %v3819_v45  ;;  %v3825_v48 = vpack.c.bf16 %v4123_v46, %v4122_v47 }
 0x4a4   : > { %v1215_v50 = vpop.permute.xlu1 %1214  ;;  %v1217_v51 = vpop.permute.xlu0 %1216 }
 0x4aa   : > { %3824 = vmatpush3.bf16.xpose.msk.msra.mxu1 %vm5124_vm8, %v3819_v45 }
 0x4ab   : > { %3827 = vmatprep.subr.msk.bf16.mxu1 %vm5124_vm8, %v3825_v48 }
 0x4b2   : > { %3830 = vmatpush3.bf16.xpose.msk.msra.mxu1 %vm5124_vm8, %v3825_v48 }
 0x4b9   : > { %3599 = vmatmul.mubr.msk.f32.vlgmr.msra.gmra.mrb[2].mxu1 %vm1130_vm7, %v1213_v49 }
 0x4ba   : > { %3601 = vmatprep.mubr.msk.f32.mxu1 %vm1130_vm7, %v1215_v50 }
 0x4bd   : > { %3602 = vmatmul.mubr.msk.f32.gmra.mrb[4].mxu1 %vm1130_vm7, %v1217_v51 }
 0x58c   : > { %v3600_v54 = vpop.f32.mrb[2].mxu1 }
 0x58d   : > { %v1342_v55 = vmul.f32 0.35355338, %v3600_v54  ;;  %v1322_v56 = vpop.f32.mrb[3].mxu1 }
 0x58e   : > { %v1341_v58 = vmul.f32 0.35355338, %v1322_v56 }
 0x58f   : > { %v1346_v60 = vsel %vm947_vm9, %v1342_v55, -1e+30 }
 0x590   : > { %v3603_v61 = vpop.f32.mrb[4].mxu1  ;;  %v1353_v62 = vsel %vm1349_vm10, %v1346_v60, -inf  ;;  %v1345_v63 = vsel %vm946_vm11, %v1341_v58, -1e+30 }
 0x591   : > { %v1344_v0 = vmul.f32 0.35355338, %v3603_v61  ;;  %1354 = vmax.xlane.f32.xlu0 %v1353_v62  ;;  %v1332_v3 = vpop.f32.mrb[5].mxu1  ;;  %v1350_v4 = vsel %vm1349_vm10, %v1345_v63, -inf }
 0x592   : > { %v1343_v5 = vmul.f32 0.35355338, %v1332_v3  ;;  %1351 = vmax.xlane.f32.xlu1 %v1350_v4 }
 0x593   : > { %v1348_v6 = vsel %vm949_vm12, %v1344_v0, -1e+30 }
 0x594   : > { %v1359_v7 = vsel %vm1349_vm10, %v1348_v6, -inf  ;;  %v1347_v8 = vsel %vm948_vm13, %v1343_v5, -1e+30 }
 0x595   : > { %v1356_v9 = vsel %vm1349_vm10, %v1347_v8, -inf }
 0x596   : > { %1360 = vmax.xlane.f32.xlu1 %v1359_v7  ;;  %1357 = vmax.xlane.f32.xlu0 %v1356_v9 }
 0x5a7   : > { %4130 = vrot.lane.b32.xlu1 %v4111_v38, %s4601_s19 }
 0x5ac   : > { %4125 = vrot.lane.b32.xlu0 %v5120_v34, %s4601_s19 }
 0x61e   : > { %v1355_v10 = vpop.xlane.xlu0 %1354 }
 0x61f   : > { %vm1363_vm14 = vcmp.lt.f32.partialorder %v1355_v10, -1e+29  ;;  %v1352_v11 = vpop.xlane.xlu1 %1351 }
 0x620   : > { %v1367_v12 = vsel %vm1363_vm14, 0.0, %v1355_v10  ;;  %vm1362_vm15 = vcmp.lt.f32.partialorder %v1352_v11, -1e+29 }
 0x621   : > { %v1371_v13 = vsub.f32 %v1342_v55, %v1367_v12  ;;  %v1366_v14 = vsel %vm1362_vm15, 0.0, %v1352_v11 }
 0x622   : > { %v1370_v15 = vsub.f32 %v1341_v58, %v1366_v14 }
 0x623   : > { %v1376_v16 = vmul.f32 1.442695, %v1371_v13  ;;  %v1361_v17 = vpop.xlane.xlu1 %1360  ;;  %v1358_v18 = vpop.xlane.xlu0 %1357 }
 0x624   : > { %v1374_v20 = vmul.f32 1.442695, %v1370_v15  ;;  %vm1365_vm1 = vcmp.lt.f32.partialorder %v1361_v17, -1e+29  ;;  %vm1364_vm2 = vcmp.lt.f32.partialorder %v1358_v18, -1e+29 }
 0x625   : > { %4216 = vpow2.f32 %v1376_v16  ;;  %v1369_v23 = vsel %vm1365_vm1, 0.0, %v1361_v17  ;;  %v1368_v24 = vsel %vm1364_vm2, 0.0, %v1358_v18  ;;  %vm1540_vm1 = vcmask 130112  }
 0x626   : > { %4218 = vpow2.f32 %v1374_v20  ;;  %v1373_v26 = vsub.f32 %v1344_v0, %v1369_v23  ;;  %v1372_v27 = vsub.f32 %v1343_v5, %v1368_v24  ;;  %vm1546_vm2 = vcmask 195712  }
 0x627   : > { %v4131_v29 = vpop.permute.xlu1 %4130  ;;  %v4126_v30 = vpop.permute.xlu0 %4125 }
 0x628   : > { %v1380_v31 = vmul.f32 1.442695, %v1373_v26  ;;  %v1378_v32 = vmul.f32 1.442695, %v1372_v27  ;;  %v4133_v33 = vunpack.i.h.bf16 %v4131_v29  ;;  %v4132_v34 = vunpack.i.l.bf16 %v4131_v29 }
 0x629   : > { %v4128_v35 = vunpack.i.h.bf16 %v4126_v30  ;;  %v4127_v38 = vunpack.i.l.bf16 %v4126_v30 }
 0x62a   : > { %4220 = vpow2.f32 %v1380_v31  ;;  %v3835_v40 = vpack.c.bf16 %v4133_v33, %v4132_v34 }
 0x62b   : > { %4222 = vpow2.f32 %v1378_v32  ;;  %v3831_v39 = vpack.c.bf16 %v4128_v35, %v4127_v38 }
 0x62d   : > { %3832 = vmatprep.subr.bf16.mxu0 %v3831_v39 }
 0x62e   : > { %3834 = vmatpush3.bf16.msra.mxu0 %v3831_v39 }
 0x62f   : > { %v4217_v41 = vpop.eup %4216  ;;  %3836 = vmatprep.subr.bf16.mxu0 %v3835_v40 }
 0x630   : > { %v4219_v42 = vpop.eup %4218  ;;  %v1383_v43 = vsel %vm947_vm9, %v4217_v41, 0.0  ;;  %v3360_v41 = vld [vmem:[%s5552_s7 + $0x28] sm:$0xff] }
 0x631   : > { %v1389_v45 = vsel %vm1349_vm10, %v1383_v43, 0.0  ;;  %v1382_v46 = vsel %vm946_vm11, %v4219_v42, 0.0 }
 0x632   : > { %3838 = vmatpush3.bf16.msra.mxu0 %v3835_v40  ;;  %1390 = vadd.xlane.f32.xlu1 %v1389_v45  ;;  %v1386_v47 = vsel %vm1349_vm10, %v1382_v46, 0.0  ;;  %v3359_v40 = vld [vmem:[%s5552_s7 + $0x20] sm:$0xff]  ;;  %v3362_v45 = vld [vmem:[%s5552_s7 + $0x38] sm:$0xff] }
 0x633   : > { %1387 = vadd.xlane.f32.xlu0 %v1386_v47  ;;  %v3848_v42 = vpack.c.bf16 %v3360_v41, %v3359_v40 }
 0x634   : > { %v4221_v48 = vpop.eup %4220 }
 0x635   : > { %v4223_v49 = vpop.eup %4222  ;;  %v1385_v50 = vsel %vm949_vm12, %v4221_v48, 0.0 }
 0x636   : > { %v1395_v51 = vsel %vm1349_vm10, %v1385_v50, 0.0  ;;  %v1384_v54 = vsel %vm948_vm13, %v4223_v49, 0.0 }
 0x637   : > { %1396 = vadd.xlane.f32.xlu1 %v1395_v51  ;;  %v1392_v55 = vsel %vm1349_vm10, %v1384_v54, 0.0  ;;  %v3357_v51 = vld [vmem:[#allocation14] ss:$0 sm:$0xff] }
 0x638   : > { %1393 = vadd.xlane.f32.xlu0 %v1392_v55  ;;  %v3358_v55 = vld [vmem:[#allocation15] ss:$0 sm:$0xff] }
 0x648   : > { %4135 = vrot.lane.b32.xlu1 %v5144_v37, %s4601_s19 }
 0x64e   : > { %4140 = vrot.lane.b32.xlu0 %v5148_v44, %s4601_s19 }
 0x6bf   : > { %v1391_v56 = vpop.xlane.xlu1 %1390 }
 0x6c0   : > { %vm1399_vm3 = vcmp.gt.f32.partialorder %v1391_v56, 0.0  ;;  %v1388_v58 = vpop.xlane.xlu0 %1387 }
 0x6c1   : > { %vm1398_vm4 = vcmp.gt.f32.partialorder %v1388_v58, 0.0  ;;  %v1403_v61 = vsel %vm1399_vm3, %v1391_v56, 1.0  ;;  %vm1552_vm3 = vcmask 261312  }
 0x6c2   : > { %v1402_v60 = vsel %vm1398_vm4, %v1388_v58, 1.0 }
 0x6c3   : > { %4224 = vrcp.f32 %v1402_v60 }
 0x6c4   : > { %v1397_v62 = vpop.xlane.xlu1 %1396  ;;  %4226 = vrcp.f32 %v1403_v61  ;;  %v1677_v61 = vld [vmem:[#allocation11 + $0x10] sm:$0xff] }
 0x6c5   : > { %vm1401_vm14 = vcmp.gt.f32.partialorder %v1397_v62, 0.0  ;;  %v1394_v63 = vpop.xlane.xlu0 %1393 }
 0x6c6   : > { %vm1400_vm15 = vcmp.gt.f32.partialorder %v1394_v63, 0.0  ;;  %v1405_v0 = vsel %vm1401_vm14, %v1397_v62, 1.0  ;;  %v1678_v62 = vld [vmem:[#allocation11 + $0x18] sm:$0xff] }
 0x6c7   : > { %v1404_v3 = vsel %vm1400_vm15, %v1394_v63, 1.0  ;;  %v3853_v63 = vpack.c.bf16 %v1678_v62, %v1677_v61 }
 0x6c8   : > { %4228 = vrcp.f32 %v1404_v3  ;;  %v4136_v4 = vpop.permute.xlu1 %4135 }
 0x6c9   : > { %v4138_v37 = vunpack.i.h.bf16 %v4136_v4  ;;  %v4137_v5 = vunpack.i.l.bf16 %v4136_v4  ;;  %v4141_v6 = vpop.permute.xlu0 %4140  ;;  %4230 = vrcp.f32 %v1405_v0  ;;  %v3364_v0 = vld [vmem:[%s5553_s8 + $0x1] ss:$0 sm:$0xff] }
 0x6ca   : > { %v4143_v44 = vunpack.i.h.bf16 %v4141_v6  ;;  %v4142_v7 = vunpack.i.l.bf16 %v4141_v6  ;;  %v3366_v6 = vld [vmem:[#allocation12 + $0x1] ss:$0 sm:$0xff] }
 0x6cb   : > { %v3839_v8 = vpack.c.bf16 %v4138_v37, %v4137_v5 }
 0x6cc   : > { %v3843_v10 = vpack.c.bf16 %v4143_v44, %v4142_v7 }
 0x6cd   : > { %v4225_v9 = vpop.eup %4224  ;;  %3840 = vmatprep.subr.bf16.mxu0 %v3839_v8 }
 0x6ce   : > { %3842 = vmatpush3.bf16.msra.mxu0 %v3839_v8  ;;  %v1410_v11 = vmul.f32 %v4225_v9, %v1382_v46  ;;  %v4227_v12 = vpop.eup %4226 }
 0x6cf   : > { %3844 = vmatprep.subr.bf16.mxu0 %v3843_v10  ;;  %v1411_v14 = vmul.f32 %v4227_v12, %v1383_v43  ;;  %v3361_v43 = vld [vmem:[%s5552_s7 + $0x30] sm:$0xff] }
 0x6d0   : > { %3620 = vmatprep.mubr.msk.f32.mxu0 %vm1349_vm10, %v1410_v11  ;;  %v3851_v46 = vpack.c.bf16 %v3362_v45, %v3361_v43 }
 0x6d2   : > { %v4229_v13 = vpop.eup %4228  ;;  %3846 = vmatpush3.bf16.msra.mxu0 %v3843_v10 }
 0x6d3   : > { %3847 = vmatprep.subr.bf16.mxu0 %v4597_v1  ;;  %v4231_v15 = vpop.eup %4230  ;;  %v1412_v16 = vmul.f32 %v4229_v13, %v1384_v54 }
 0x6d4   : > { %v1413_v17 = vmul.f32 %v4231_v15, %v1385_v50 }
 0x6d5   : > { %3621 = vmatmul.mubr.msk.f32.vlgmr.msra.gmra.mrb[4].mxu0 %vm1349_vm10, %v1411_v14 }
 0x6d6   : > { %3623 = vmatprep.mubr.msk.f32.mxu0 %vm1349_vm10, %v1412_v16  ;;  %3849 = vmatpush3.bf16.msra.mxu0 %v3848_v42 }
 0x6d7   : > { %3850 = vmatprep.subr.bf16.mxu0 %v4597_v1 }
 0x6d9   : > { %3624 = vmatmul.mubr.msk.f32.gmra.mrb[6].mxu0 %vm1349_vm10, %v1413_v17 }
 0x6da   : > { %3634 = vmatprep.mubr.msk.f32.mxu0 %vm4598_vm0, %v4599_v2  ;;  %3852 = vmatpush3.bf16.msra.mxu0 %v3851_v46 }
 0x6db   : > { %3854 = vmatprep.subr.bf16.mxu0 %v3853_v63 }
 0x7a8   : > { %v3622_v18 = vpop.f32.mrb[4].mxu0 }
 0x7a9   : > { %1537 = vrot.lane.b32.xlu1 %v3622_v18, %s4605_s3  ;;  %v1516_v20 = vpop.f32.mrb[5].mxu0 }
 0x7aa   : > { %1535 = vst.msk [vmem:[#allocation2] sm:$0xff] %vm1130_vm7, %v1516_v20 }
 0x7ac   : > { %v3625_v23 = vpop.f32.mrb[6].mxu0 }
 0x7ad   : > { %1549 = vrot.lane.b32.xlu1 %v3625_v23, %s4606_s20  ;;  %v1526_v24 = vpop.f32.mrb[7].mxu0 }
 0x7ae   : > { %1543 = vrot.lane.b32.xlu0 %v1526_v24, %s4607_s21 }
 0x7b2   : > { %1555 = vrot.lane.b32.xlu0 %v5110_v25, %s4608_s29 }
 0x81b   : > { %v1538_v26 = vpop.permute.xlu1 %1537 }
 0x81c   : > { %1541 = vst.msk [vmem:[#allocation2] sm:$0xff] %vm1540_vm1, %v1538_v26 }
 0x81f   : > { %v1550_v29 = vpop.permute.xlu1 %1549 }
 0x820   : > { %v1544_v27 = vpop.permute.xlu0 %1543 }
 0x821   : > { %1547 = vst.msk [vmem:[#allocation2] sm:$0xff] %vm1546_vm2, %v1544_v27 }
 0x822   : > { %1553 = vst.msk [vmem:[#allocation2] sm:$0xff] %vm1552_vm3, %v1550_v29 }
 0x824   : > { %v1556_v31 = vpop.permute.xlu0 %1555 }
 0x829   : > { %v1554_v30 = vld [vmem:[#allocation2] sm:$0xff] }
 0x82a   : > { %v1558_v32 = vadd.f32 %v1556_v31, %v1554_v30 }
 0x82c   : > { %v1559_v33 = vsel %vm961_vm5, %v1558_v32, 0.0 }
 0x82d   : > { %1560 = vadd.xlane.f32.xlu1 %v1559_v33 }
 0x8ba   : > { %v1561_v34 = vpop.xlane.xlu1 %1560 }
 0x8bb   : > { %v1563_v25 = vmul.f32 0.03125, %v1561_v34 }
 0x8bd   : > { %v1564_v35 = vsub.f32 %v1558_v32, %v1563_v25 }
 0x8bf   : > { %v1565_v38 = vmul.f32 %v1564_v35, %v1564_v35 }
 0x8c1   : > { %v1566_v39 = vsel %vm961_vm5, %v1565_v38, 0.0 }
 0x8c2   : > { %1567 = vadd.xlane.f32.xlu0 %v1566_v39 }
 0x94f   : > { %v1568_v47 = vpop.xlane.xlu0 %1567 }
 0x950   : > { %v1569_v48 = vmul.f32 0.03125, %v1568_v47 }
 0x952   : > { %v1570_v49 = vadd.f32 1e-05, %v1569_v48 }
 0x954   : > { %4232 = vrsqrt.f32 %v1570_v49 }
 0x95e   : > { %v4233_v50 = vpop.eup %4232 }
 0x95f   : > { %v1572_v54 = vmul.f32 %v4233_v50, %v1564_v35 }
 0x961   : > { %v1580_v56 = vmul.f32 %v3357_v51, %v1572_v54 }
 0x963   : > { %v1588_v58 = vadd.f32 %v3358_v55, %v1580_v56 }
 0x965   : > { %v1589_v60 = vmax.f32 %v1588_v58, 0.0 }
 0x967   : > { %3635 = vmatmul.mubr.msk.f32.vlgmr.msra.gmra.mrb[8].mxu0 %vm961_vm5, %v1589_v60 }
 0x968   : > { %3641 = vmatprep.mubr.msk.f32.mxu0 %vm1044_vm6, %v5086_v19  ;;  %3856 = vmatpush3.bf16.msra.mxu0 %v3853_v63 }
 0x96b   : > { %3642 = vmatmul.mubr.msk.f32.vlgmr.msra.gmra.mrb[10].mxu0 %vm1044_vm6, %v5091_v21 }
 0x96c   : > { %3646 = vmatprep.mubr.msk.f32.mxu0 %vm1130_vm7, %v5103_v22 }
 0xa3a   : > { %v1672_v3 = vpop.f32.mrb[8].mxu0 }
 0xa3b   : > { %v5255_v4 = vadd.f32 %v3364_v0, %v1672_v3  ;;  %v3636_v37 = vpop.f32.mrb[9].mxu0 }
 0xa3d   : > { %1763 = vrot.lane.b32.xlu0 %v5255_v4, %s4601_s19  ;;  %3665 = vmatprep.mubr.msk.f32.mxu1 %vm1130_vm7, %v5255_v4 }
 0xaaf   : > { %v1764_v5 = vpop.permute.xlu0 %1763 }
 0xab0   : > { %3644 = vmatprep.subr.mxu0 %v1764_v5 }
 0xab1   : > { %3645 = vmatpush3.msra.mxu0 %v1764_v5 }
 0xab2   : > { %3647 = vmatmul.mubr.msk.f32.vlgmr.msra.gmra.mrb[10].mxu0 %vm1130_vm7, %v5116_v28 }
 0xb85   : > { %v3648_v44 = vpop.f32.mrb[10].mxu0 }
 0xb86   : > { %v3967_v7 = vadd.f32 %v3648_v44, %v3366_v6  ;;  %v1832_v8 = vpop.f32.mrb[11].mxu0 }
 0xb87   : > { %v3968_v9 = vadd.f32 %v3366_v6, %v1832_v8 }
 0xb89   : > { %v4154_v10 = vpack.i.bf16 %v3967_v7, %v3968_v9  ;;  %v3857_v11 = vpack.c.bf16 %v3967_v7, %v3968_v9 }
 0xb8b   : > { %4155 = vrot.lane.b32.xlu0 %v4154_v10, %s4604_s9  ;;  %4145 = vrot.lane.b32.xlu1 %v4154_v10, %s4603_s23 }
 0xb8c   : > { %3859 = vmatprep.subr.msk.bf16.mxu1 %vm5124_vm8, %v3857_v11 }
 0xb8d   : > { %3862 = vmatpush3.bf16.xpose.msk.msra.mxu1 %vm5124_vm8, %v3857_v11 }
 0xb8f   : > { %1843 = vrot.lane.b32.xlu0 %v5255_v4, %s4602_s15  ;;  %4150 = vrot.lane.b32.xlu1 %v4154_v10, %s4602_s15 }
 0xb93   : > { %1841 = vrot.lane.b32.xlu1 %v5255_v4, %s4603_s23 }
 0xb97   : > { %1845 = vrot.lane.b32.xlu1 %v5255_v4, %s4604_s9 }
 0xbfd   : > { %v5276_v12 = vpop.permute.xlu0 %4155  ;;  %v5278_v13 = vpop.permute.xlu1 %4145 }
 0xbfe   : > { %v4158_v14 = vunpack.i.h.bf16 %v5276_v12  ;;  %v4157_v15 = vunpack.i.l.bf16 %v5276_v12  ;;  %v4148_v16 = vunpack.i.h.bf16 %v5278_v13  ;;  %v4147_v17 = vunpack.i.l.bf16 %v5278_v13 }
 0xc00   : > { %v3863_v18 = vpack.c.bf16 %v4148_v16, %v4147_v17  ;;  %v3875_v27 = vpack.c.bf16 %v4158_v14, %v4157_v15 }
 0xc01   : > { %v5284_v20 = vpop.permute.xlu1 %4150  ;;  %v1844_v30 = vpop.permute.xlu0 %1843 }
 0xc02   : > { %v4153_v23 = vunpack.i.h.bf16 %v5284_v20  ;;  %v4152_v24 = vunpack.i.l.bf16 %v5284_v20  ;;  %3865 = vmatprep.subr.msk.bf16.mxu1 %vm5124_vm8, %v3863_v18 }
 0xc03   : > { %3868 = vmatpush3.bf16.xpose.msk.msra.mxu1 %vm5124_vm8, %v3863_v18 }
 0xc04   : > { %v3869_v26 = vpack.c.bf16 %v4153_v23, %v4152_v24 }
 0xc05   : > { %v1842_v29 = vpop.permute.xlu1 %1841 }
 0xc06   : > { %3871 = vmatprep.subr.msk.bf16.mxu1 %vm5124_vm8, %v3869_v26 }
 0xc09   : > { %v1846_v31 = vpop.permute.xlu1 %1845 }
 0xc0b   : > { %3874 = vmatpush3.bf16.xpose.msk.msra.mxu1 %vm5124_vm8, %v3869_v26 }
 0xc0c   : > { %3877 = vmatprep.subr.msk.bf16.mxu1 %vm5124_vm8, %v3875_v27 }
 0xc13   : > { %3880 = vmatpush3.bf16.xpose.msk.msra.mxu1 %vm5124_vm8, %v3875_v27 }
 0xc1a   : > { %3666 = vmatmul.mubr.msk.f32.vlgmr.msra.gmra.mrb[6].mxu1 %vm1130_vm7, %v1842_v29 }
 0xc1b   : > { %3668 = vmatprep.mubr.msk.f32.mxu1 %vm1130_vm7, %v1844_v30 }
 0xc1e   : > { %3669 = vmatmul.mubr.msk.f32.gmra.mrb[8].mxu1 %vm1130_vm7, %v1846_v31 }
 0xced   : > { %v3667_v32 = vpop.f32.mrb[6].mxu1 }
 0xcee   : > { %v1971_v33 = vmul.f32 0.35355338, %v3667_v32  ;;  %v1951_v34 = vpop.f32.mrb[7].mxu1 }
 0xcef   : > { %v1970_v25 = vmul.f32 0.35355338, %v1951_v34 }
 0xcf0   : > { %v1975_v35 = vsel %vm947_vm9, %v1971_v33, -1e+30 }
 0xcf1   : > { %v3670_v38 = vpop.f32.mrb[8].mxu1  ;;  %v1981_v39 = vsel %vm1349_vm10, %v1975_v35, -inf  ;;  %v1974_v40 = vsel %vm946_vm11, %v1970_v25, -1e+30 }
 0xcf2   : > { %1982 = vmax.xlane.f32.xlu1 %v1981_v39  ;;  %v1961_v41 = vpop.f32.mrb[9].mxu1  ;;  %v1978_v42 = vsel %vm1349_vm10, %v1974_v40, -inf  ;;  %v1973_v43 = vmul.f32 0.35355338, %v3670_v38 }
 0xcf3   : > { %v1972_v45 = vmul.f32 0.35355338, %v1961_v41  ;;  %1979 = vmax.xlane.f32.xlu0 %v1978_v42 }
 0xcf4   : > { %v1977_v48 = vsel %vm949_vm12, %v1973_v43, -1e+30 }
 0xcf5   : > { %v1976_v46 = vsel %vm948_vm13, %v1972_v45, -1e+30  ;;  %v1987_v49 = vsel %vm1349_vm10, %v1977_v48, -inf }
 0xcf6   : > { %v1984_v47 = vsel %vm1349_vm10, %v1976_v46, -inf }
 0xcf7   : > { %1985 = vmax.xlane.f32.xlu0 %v1984_v47 }
 0xcfb   : > { %1988 = vmax.xlane.f32.xlu0 %v1987_v49 }
 0xd03   : > { %4160 = vrot.lane.b32.xlu1 %v4154_v10, %s4601_s19 }
 0xd7f   : > { %v1983_v50 = vpop.xlane.xlu1 %1982 }
 0xd80   : > { %vm1991_vm4 = vcmp.lt.f32.partialorder %v1983_v50, -1e+29  ;;  %v1980_v51 = vpop.xlane.xlu0 %1979 }
 0xd81   : > { %v1995_v54 = vsel %vm1991_vm4, 0.0, %v1983_v50  ;;  %vm1990_vm14 = vcmp.lt.f32.partialorder %v1980_v51, -1e+29 }
 0xd82   : > { %v1999_v55 = vsub.f32 %v1971_v33, %v1995_v54  ;;  %v1994_v56 = vsel %vm1990_vm14, 0.0, %v1980_v51 }
 0xd83   : > { %v1998_v58 = vsub.f32 %v1970_v25, %v1994_v56  ;;  %v4161_v60 = vpop.permute.xlu1 %4160 }
 0xd84   : > { %v2004_v61 = vmul.f32 1.442695, %v1999_v55  ;;  %v4163_v62 = vunpack.i.h.bf16 %v4161_v60  ;;  %v4162_v63 = vunpack.i.l.bf16 %v4161_v60  ;;  %v1986_v0 = vpop.xlane.xlu0 %1985 }
 0xd85   : > { %v2002_v3 = vmul.f32 1.442695, %v1998_v58  ;;  %vm1992_vm4 = vcmp.lt.f32.partialorder %v1986_v0, -1e+29 }
 0xd86   : > { %4234 = vpow2.f32 %v2004_v61  ;;  %v3881_v37 = vpack.c.bf16 %v4163_v62, %v4162_v63  ;;  %v1996_v23 = vsel %vm1992_vm4, 0.0, %v1986_v0 }
 0xd87   : > { %4236 = vpow2.f32 %v2002_v3  ;;  %v2000_v24 = vsub.f32 %v1972_v45, %v1996_v23  ;;  %v3391_v23 = vld [vmem:[%s5552_s7 + $0x50] sm:$0xff] }
 0xd88   : > { %3882 = vmatprep.subr.bf16.mxu0 %v3881_v37  ;;  %v1989_v5 = vpop.xlane.xlu0 %1988 }
 0xd89   : > { %vm1993_vm15 = vcmp.lt.f32.partialorder %v1989_v5, -1e+29  ;;  %3884 = vmatpush3.bf16.msra.mxu0 %v3881_v37  ;;  %v2006_v26 = vmul.f32 1.442695, %v2000_v24  ;;  %v3392_v24 = vld [vmem:[%s5552_s7 + $0x58] sm:$0xff] }
 0xd8a   : > { %v1997_v6 = vsel %vm1993_vm15, 0.0, %v1989_v5 }
 0xd8b   : > { %v2001_v44 = vsub.f32 %v1973_v43, %v1997_v6 }
 0xd8d   : > { %v2008_v7 = vmul.f32 1.442695, %v2001_v44 }
 0xd8f   : > { %4238 = vpow2.f32 %v2008_v7 }
 0xd90   : > { %v4235_v8 = vpop.eup %4234  ;;  %4240 = vpow2.f32 %v2006_v26  ;;  %v3901_v26 = vpack.c.bf16 %v3392_v24, %v3391_v23 }
 0xd91   : > { %v4237_v9 = vpop.eup %4236  ;;  %v2011_v10 = vsel %vm947_vm9, %v4235_v8, 0.0 }
 0xd92   : > { %v2017_v11 = vsel %vm1349_vm10, %v2011_v10, 0.0  ;;  %v2010_v14 = vsel %vm946_vm11, %v4237_v9, 0.0 }
 0xd93   : > { %2018 = vadd.xlane.f32.xlu0 %v2017_v11  ;;  %v2014_v15 = vsel %vm1349_vm10, %v2010_v14, 0.0 }
 0xd94   : > { %2015 = vadd.xlane.f32.xlu1 %v2014_v15 }
 0xd99   : > { %v4239_v16 = vpop.eup %4238 }
 0xd9a   : > { %v2013_v17 = vsel %vm949_vm12, %v4239_v16, 0.0  ;;  %v4241_v27 = vpop.eup %4240  ;;  %v3389_v16 = vld [vmem:[%s5552_s7 + $0x40] sm:$0xff] }
 0xd9b   : > { %v2023_v18 = vsel %vm1349_vm10, %v2013_v17, 0.0  ;;  %v2012_v29 = vsel %vm948_vm13, %v4241_v27, 0.0 }
 0xd9c   : > { %2024 = vadd.xlane.f32.xlu0 %v2023_v18  ;;  %v2020_v30 = vsel %vm1349_vm10, %v2012_v29, 0.0 }
 0xda5   : > { %4170 = vrot.lane.b32.xlu1 %v5284_v20, %s4601_s19 }
 0xdb2   : > { %4165 = vrot.lane.b32.xlu0 %v5278_v13, %s4601_s19 }
 0xdc9   : > { %2021 = vadd.xlane.f32.xlu1 %v2020_v30 }
 0xdda   : > { %4175 = vrot.lane.b32.xlu1 %v5276_v12, %s4601_s19 }
 0xe20   : > { %v2019_v32 = vpop.xlane.xlu0 %2018 }
 0xe21   : > { %v2016_v31 = vpop.xlane.xlu1 %2015  ;;  %vm2027_vm15 = vcmp.gt.f32.partialorder %v2019_v32, 0.0 }
 0xe22   : > { %vm2026_vm14 = vcmp.gt.f32.partialorder %v2016_v31, 0.0  ;;  %v2031_v12 = vsel %vm2027_vm15, %v2019_v32, 1.0 }
 0xe23   : > { %v2030_v20 = vsel %vm2026_vm14, %v2016_v31, 1.0 }
 0xe24   : > { %4242 = vrcp.f32 %v2030_v20  ;;  %v3387_v20 = vld [vmem:[#allocation14 + $0x1] ss:$0 sm:$0xff] }
 0xe25   : > { %v4171_v34 = vpop.permute.xlu1 %4170  ;;  %4244 = vrcp.f32 %v2031_v12 }
 0xe26   : > { %v4173_v35 = vunpack.i.h.bf16 %v4171_v34  ;;  %v4172_v38 = vunpack.i.l.bf16 %v4171_v34 }
 0xe28   : > { %v3889_v43 = vpack.c.bf16 %v4173_v35, %v4172_v38  ;;  %v2303_v35 = vld [vmem:[#allocation11 + $0x20] sm:$0xff]  ;;  %v2304_v38 = vld [vmem:[#allocation11 + $0x28] sm:$0xff] }
 0xe29   : > { %v2025_v33 = vpop.xlane.xlu0 %2024 }
 0xe2a   : > { %vm2029_vm4 = vcmp.gt.f32.partialorder %v2025_v33, 0.0 }
 0xe2b   : > { %v2033_v45 = vsel %vm2029_vm4, %v2025_v33, 1.0  ;;  %v3388_v33 = vld [vmem:[#allocation15 + $0x1] ss:$0 sm:$0xff] }
 0xe2c   : > { %4246 = vrcp.f32 %v2033_v45 }
 0xe2d   : > { %v4166_v13 = vpop.permute.xlu0 %4165 }
 0xe2e   : > { %v4243_v25 = vpop.eup %4242  ;;  %v4168_v39 = vunpack.i.h.bf16 %v4166_v13  ;;  %v4167_v40 = vunpack.i.l.bf16 %v4166_v13 }
 0xe2f   : > { %v2038_v41 = vmul.f32 %v4243_v25, %v2010_v14  ;;  %v4245_v54 = vpop.eup %4244 }
 0xe30   : > { %v3885_v42 = vpack.c.bf16 %v4168_v39, %v4167_v40  ;;  %v2039_v55 = vmul.f32 %v4245_v54, %v2011_v10  ;;  %v3903_v39 = vpack.c.bf16 %v2304_v38, %v2303_v35  ;;  %v3394_v40 = vld [vmem:[%s5553_s8 + $0x2] ss:$0 sm:$0xff] }
 0xe31   : > { %3687 = vmatprep.mubr.msk.f32.mxu0 %vm1349_vm10, %v2038_v41 }
 0xe32   : > { %3886 = vmatprep.subr.bf16.mxu0 %v3885_v42 }
 0xe33   : > { %3888 = vmatpush3.bf16.msra.mxu0 %v3885_v42 }
 0xe34   : > { %3890 = vmatprep.subr.bf16.mxu0 %v3889_v43 }
 0xe36   : > { %v4247_v56 = vpop.eup %4246 }
 0xe37   : > { %3892 = vmatpush3.bf16.msra.mxu0 %v3889_v43  ;;  %v2041_v61 = vmul.f32 %v4247_v56, %v2013_v17  ;;  %v3390_v17 = vld [vmem:[%s5552_s7 + $0x48] sm:$0xff] }
 0xe38   : > { %v3898_v18 = vpack.c.bf16 %v3390_v17, %v3389_v16 }
 0xe56   : > { %v2022_v46 = vpop.xlane.xlu1 %2021 }
 0xe57   : > { %vm2028_vm14 = vcmp.gt.f32.partialorder %v2022_v46, 0.0 }
 0xe58   : > { %v2032_v47 = vsel %vm2028_vm14, %v2022_v46, 1.0  ;;  %vm2897_vm14 = vcmask 7168  }
 0xe59   : > { %4248 = vrcp.f32 %v2032_v47 }
 0xe5a   : > { %v4176_v48 = vpop.permute.xlu1 %4175 }
 0xe5b   : > { %v4178_v49 = vunpack.i.h.bf16 %v4176_v48  ;;  %v4177_v50 = vunpack.i.l.bf16 %v4176_v48 }
 0xe5d   : > { %v3893_v51 = vpack.c.bf16 %v4178_v49, %v4177_v50 }
 0xe5f   : > { %3894 = vmatprep.subr.bf16.mxu0 %v3893_v51 }
 0xe60   : > { %3896 = vmatpush3.bf16.msra.mxu0 %v3893_v51 }
 0xe61   : > { %3897 = vmatprep.subr.bf16.mxu0 %v4597_v1 }
 0xe63   : > { %v4249_v58 = vpop.eup %4248  ;;  %3688 = vmatmul.mubr.msk.f32.vlgmr.msra.gmra.mrb[12].mxu0 %vm1349_vm10, %v2039_v55 }
 0xe64   : > { %v2040_v60 = vmul.f32 %v4249_v58, %v2012_v29  ;;  %3899 = vmatpush3.bf16.msra.mxu0 %v3898_v18 }
 0xe65   : > { %3900 = vmatprep.subr.bf16.mxu0 %v4597_v1 }
 0xe66   : > { %3690 = vmatprep.mubr.msk.f32.mxu0 %vm1349_vm10, %v2040_v60 }
 0xe67   : > { %3691 = vmatmul.mubr.msk.f32.gmra.mrb[14].mxu0 %vm1349_vm10, %v2041_v61 }
 0xe68   : > { %3701 = vmatprep.mubr.msk.f32.mxu0 %vm4598_vm0, %v4599_v2  ;;  %3902 = vmatpush3.bf16.msra.mxu0 %v3901_v26 }
 0xe69   : > { %3904 = vmatprep.subr.bf16.mxu0 %v3903_v39 }
 0xf36   : > { %v3689_v62 = vpop.f32.mrb[12].mxu0 }
 0xf37   : > { %2165 = vrot.lane.b32.xlu0 %v3689_v62, %s4605_s3  ;;  %v2144_v63 = vpop.f32.mrb[13].mxu0 }
 0xf38   : > { %2163 = vst.msk [vmem:[#allocation2] sm:$0xff] %vm1130_vm7, %v2144_v63 }
 0xf3a   : > { %v3692_v0 = vpop.f32.mrb[14].mxu0 }
 0xf3b   : > { %2175 = vrot.lane.b32.xlu0 %v3692_v0, %s4606_s20  ;;  %v2154_v3 = vpop.f32.mrb[15].mxu0 }
 0xf3c   : > { %2170 = vrot.lane.b32.xlu1 %v2154_v3, %s4607_s21 }
 0xf40   : > { %2180 = vrot.lane.b32.xlu1 %v5255_v4, %s4608_s29 }
 0xfa9   : > { %v2166_v37 = vpop.permute.xlu0 %2165 }
 0xfaa   : > { %2168 = vst.msk [vmem:[#allocation2] sm:$0xff] %vm1540_vm1, %v2166_v37 }
 0xfad   : > { %v2176_v6 = vpop.permute.xlu0 %2175 }
 0xfae   : > { %v2171_v5 = vpop.permute.xlu1 %2170 }
 0xfaf   : > { %2173 = vst.msk [vmem:[#allocation2] sm:$0xff] %vm1546_vm2, %v2171_v5 }
 0xfb0   : > { %2178 = vst.msk [vmem:[#allocation2] sm:$0xff] %vm1552_vm3, %v2176_v6 }
 0xfb2   : > { %v2181_v7 = vpop.permute.xlu1 %2180 }
 0xfb7   : > { %v2179_v44 = vld [vmem:[#allocation2] sm:$0xff] }
 0xfb8   : > { %v2183_v8 = vadd.f32 %v2181_v7, %v2179_v44 }
 0xfba   : > { %v2184_v9 = vsel %vm961_vm5, %v2183_v8, 0.0 }
 0xfbb   : > { %2185 = vadd.xlane.f32.xlu0 %v2184_v9 }
0x1048   : > { %v2186_v10 = vpop.xlane.xlu0 %2185 }
0x1049   : > { %v2187_v11 = vmul.f32 0.03125, %v2186_v10 }
0x104b   : > { %v2188_v14 = vsub.f32 %v2183_v8, %v2187_v11 }
0x104d   : > { %v2189_v15 = vmul.f32 %v2188_v14, %v2188_v14 }
0x104f   : > { %v2190_v4 = vsel %vm961_vm5, %v2189_v15, 0.0 }
0x1050   : > { %2191 = vadd.xlane.f32.xlu1 %v2190_v4 }
0x10dd   : > { %v2192_v27 = vpop.xlane.xlu1 %2191 }
0x10de   : > { %v2193_v29 = vmul.f32 0.03125, %v2192_v27 }
0x10e0   : > { %v2194_v30 = vadd.f32 1e-05, %v2193_v29 }
0x10e2   : > { %4250 = vrsqrt.f32 %v2194_v30 }
0x10ec   : > { %v4251_v31 = vpop.eup %4250 }
0x10ed   : > { %v2196_v32 = vmul.f32 %v4251_v31, %v2188_v14 }
0x10ef   : > { %v2205_v34 = vmul.f32 %v3387_v20, %v2196_v32 }
0x10f1   : > { %v2214_v13 = vadd.f32 %v3388_v33, %v2205_v34 }
0x10f3   : > { %v2215_v25 = vmax.f32 %v2214_v13, 0.0 }
0x10f5   : > { %3702 = vmatmul.mubr.msk.f32.vlgmr.msra.gmra.mrb[16].mxu0 %vm961_vm5, %v2215_v25 }
0x10f6   : > { %3708 = vmatprep.mubr.msk.f32.mxu0 %vm1044_vm6, %v5086_v19  ;;  %3906 = vmatpush3.bf16.msra.mxu0 %v3903_v39 }
0x10f9   : > { %3709 = vmatmul.mubr.msk.f32.vlgmr.msra.gmra.mrb[18].mxu0 %vm1044_vm6, %v5091_v21  ;;  %v3396_v21 = vld [vmem:[#allocation12 + $0x2] ss:$0 sm:$0xff] }
0x10fa   : > { %3713 = vmatprep.mubr.msk.f32.mxu0 %vm1130_vm7, %v5103_v22 }
0x11c8   : > { %v2298_v41 = vpop.f32.mrb[16].mxu0 }
0x11c9   : > { %v5375_v42 = vadd.f32 %v3394_v40, %v2298_v41  ;;  %v3703_v43 = vpop.f32.mrb[17].mxu0 }
0x11cb   : > { %2389 = vrot.lane.b32.xlu0 %v5375_v42, %s4601_s19  ;;  %3732 = vmatprep.mubr.msk.f32.mxu1 %vm1130_vm7, %v5375_v42 }
0x123d   : > { %v2390_v19 = vpop.permute.xlu0 %2389 }
0x123e   : > { %3711 = vmatprep.subr.mxu0 %v2390_v19 }
0x123f   : > { %3712 = vmatpush3.msra.mxu0 %v2390_v19 }
0x1240   : > { %3714 = vmatmul.mubr.msk.f32.vlgmr.msra.gmra.mrb[18].mxu0 %vm1130_vm7, %v5116_v28 }
0x1313   : > { %v3715_v22 = vpop.f32.mrb[18].mxu0 }
0x1314   : > { %v3969_v12 = vadd.f32 %v3715_v22, %v3396_v21  ;;  %v2458_v45 = vpop.f32.mrb[19].mxu0 }
0x1315   : > { %v3970_v46 = vadd.f32 %v3396_v21, %v2458_v45 }
0x1317   : > { %v4184_v47 = vpack.i.bf16 %v3969_v12, %v3970_v46  ;;  %v3907_v48 = vpack.c.bf16 %v3969_v12, %v3970_v46 }
0x1319   : > { %4185 = vrot.lane.b32.xlu0 %v4184_v47, %s4602_s15  ;;  %4180 = vrot.lane.b32.xlu1 %v4184_v47, %s4603_s23 }
0x131a   : > { %3909 = vmatprep.subr.msk.bf16.mxu1 %vm5124_vm8, %v3907_v48 }
0x131b   : > { %3912 = vmatpush3.bf16.xpose.msk.msra.mxu1 %vm5124_vm8, %v3907_v48 }
0x131d   : > { %2467 = vrot.lane.b32.xlu0 %v5375_v42, %s4603_s23  ;;  %4190 = vrot.lane.b32.xlu1 %v4184_v47, %s4604_s9  ;;  %s5628_s23 = sld [smem:[#allocation35_spill]] }
0x1321   : > { %2471 = vrot.lane.b32.xlu0 %v5375_v42, %s4604_s9  ;;  %2469 = vrot.lane.b32.xlu1 %v5375_v42, %s4602_s15  ;;  %s5623_s9 = sld [smem:[#allocation28_spill]] }
0x138b   : > { %v5396_v28 = vpop.permute.xlu0 %4185  ;;  %v4181_v49 = vpop.permute.xlu1 %4180 }
0x138c   : > { %v4188_v50 = vunpack.i.h.bf16 %v5396_v28  ;;  %v4187_v51 = vunpack.i.l.bf16 %v5396_v28  ;;  %v4183_v54 = vunpack.i.h.bf16 %v4181_v49  ;;  %v4182_v55 = vunpack.i.l.bf16 %v4181_v49 }
0x138e   : > { %v3913_v56 = vpack.c.bf16 %v4183_v54, %v4182_v55  ;;  %v3919_v60 = vpack.c.bf16 %v4188_v50, %v4187_v51 }
0x138f   : > { %v5400_v58 = vpop.permute.xlu1 %4190  ;;  %v2468_v0 = vpop.permute.xlu0 %2467 }
0x1390   : > { %v4193_v61 = vunpack.i.h.bf16 %v5400_v58  ;;  %v4192_v62 = vunpack.i.l.bf16 %v5400_v58  ;;  %3915 = vmatprep.subr.msk.bf16.mxu1 %vm5124_vm8, %v3913_v56 }
0x1391   : > { %3918 = vmatpush3.bf16.xpose.msk.msra.mxu1 %vm5124_vm8, %v3913_v56 }
0x1392   : > { %3921 = vmatprep.subr.msk.bf16.mxu1 %vm5124_vm8, %v3919_v60  ;;  %v3925_v63 = vpack.c.bf16 %v4193_v61, %v4192_v62 }
0x1393   : > { %v2470_v3 = vpop.permute.xlu1 %2469  ;;  %v2472_v37 = vpop.permute.xlu0 %2471 }
0x1399   : > { %3924 = vmatpush3.bf16.xpose.msk.msra.mxu1 %vm5124_vm8, %v3919_v60 }
0x139a   : > { %3927 = vmatprep.subr.msk.bf16.mxu1 %vm5124_vm8, %v3925_v63 }
0x13a1   : > { %3930 = vmatpush3.bf16.xpose.msk.msra.mxu1 %vm5124_vm8, %v3925_v63 }
0x13a2   : > { %3959 = vmatprep.subr.bf16.mxu1 %v4597_v1 }
0x13a8   : > { %3733 = vmatmul.mubr.msk.f32.vlgmr.msra.gmra.mrb[10].mxu1 %vm1130_vm7, %v2468_v0 }
0x13a9   : > { %3735 = vmatprep.mubr.msk.f32.mxu1 %vm1130_vm7, %v2470_v3 }
0x13ac   : > { %3736 = vmatmul.mubr.msk.f32.gmra.mrb[12].mxu1 %vm1130_vm7, %v2472_v37 }
0x13ad   : > { %3790 = vmatprep.mubr.msk.f32.mxu1 %vm4598_vm0, %v4599_v2 }
0x147b   : > { %v3734_v5 = vpop.f32.mrb[10].mxu1 }
0x147c   : > { %v2597_v6 = vmul.f32 0.35355338, %v3734_v5  ;;  %v2577_v44 = vpop.f32.mrb[11].mxu1 }
0x147d   : > { %v2596_v7 = vmul.f32 0.35355338, %v2577_v44 }
0x147e   : > { %v2601_v36 = vsel %vm947_vm9, %v2597_v6, -1e+30 }
0x147f   : > { %v3737_v8 = vpop.f32.mrb[12].mxu1  ;;  %v2607_v9 = vsel %vm1349_vm10, %v2601_v36, -inf  ;;  %v2600_v10 = vsel %vm946_vm11, %v2596_v7, -1e+30 }
0x1480   : > { %v2599_v11 = vmul.f32 0.35355338, %v3737_v8  ;;  %2608 = vmax.xlane.f32.xlu0 %v2607_v9  ;;  %v2587_v14 = vpop.f32.mrb[13].mxu1  ;;  %v2604_v15 = vsel %vm1349_vm10, %v2600_v10, -inf }
0x1481   : > { %v2598_v4 = vmul.f32 0.35355338, %v2587_v14  ;;  %2605 = vmax.xlane.f32.xlu1 %v2604_v15 }
0x1482   : > { %v2603_v16 = vsel %vm949_vm12, %v2599_v11, -1e+30 }
0x1483   : > { %v2613_v17 = vsel %vm1349_vm10, %v2603_v16, -inf  ;;  %v2602_v18 = vsel %vm948_vm13, %v2598_v4, -1e+30 }
0x1484   : > { %v2610_v23 = vsel %vm1349_vm10, %v2602_v18, -inf }
0x1485   : > { %2614 = vmax.xlane.f32.xlu1 %v2613_v17  ;;  %2611 = vmax.xlane.f32.xlu0 %v2610_v23  ;;  %v4609_v23 = vmov 0  }
0x1486   : > { %4215 = vset.pattern.permute.xlu1 %v4609_v23  ;;  %4214 = vset.pattern.permute.xlu0 %v4609_v23 }
0x1496   : > { %4200 = vrot.lane.b32.xlu1 %v4181_v49, %s4601_s19 }
0x149b   : > { %4195 = vrot.lane.b32.xlu0 %v4184_v47, %s4601_s19 }
0x150d   : > { %v2609_v24 = vpop.xlane.xlu0 %2608 }
0x150e   : > { %vm2617_vm6 = vcmp.lt.f32.partialorder %v2609_v24, -1e+29  ;;  %v2606_v26 = vpop.xlane.xlu1 %2605 }
0x150f   : > { %v2621_v27 = vsel %vm2617_vm6, 0.0, %v2609_v24  ;;  %vm2616_vm8 = vcmp.lt.f32.partialorder %v2606_v26, -1e+29 }
0x1510   : > { %v2625_v29 = vsub.f32 %v2597_v6, %v2621_v27  ;;  %v2620_v30 = vsel %vm2616_vm8, 0.0, %v2606_v26 }
0x1511   : > { %v2624_v31 = vsub.f32 %v2596_v7, %v2620_v30 }
0x1512   : > { %v2630_v20 = vmul.f32 1.442695, %v2625_v29  ;;  %v2615_v32 = vpop.xlane.xlu1 %2614  ;;  %v2612_v33 = vpop.xlane.xlu0 %2611 }
0x1513   : > { %v2628_v34 = vmul.f32 1.442695, %v2624_v31  ;;  %vm2619_vm15 = vcmp.lt.f32.partialorder %v2615_v32, -1e+29  ;;  %vm2618_vm4 = vcmp.lt.f32.partialorder %v2612_v33, -1e+29 }
0x1514   : > { %4252 = vpow2.f32 %v2630_v20  ;;  %v2623_v13 = vsel %vm2619_vm15, 0.0, %v2615_v32  ;;  %v2622_v25 = vsel %vm2618_vm4, 0.0, %v2612_v33  ;;  %v2810_v31 = vld [vmem:[%s5624_s30] sm:$0xff]  ;;  %v2811_v20 = vld [vmem:[%s5624_s30 + $0x8] sm:$0xff] }
0x1515   : > { %4254 = vpow2.f32 %v2628_v34  ;;  %v2627_v35 = vsub.f32 %v2599_v11, %v2623_v13  ;;  %v2626_v38 = vsub.f32 %v2598_v4, %v2622_v25  ;;  %v3948_v32 = vpack.c.bf16 %v2811_v20, %v2810_v31 }
0x1516   : > { %v4201_v39 = vpop.permute.xlu1 %4200  ;;  %v4196_v40 = vpop.permute.xlu0 %4195 }
0x1517   : > { %v2634_v41 = vmul.f32 1.442695, %v2627_v35  ;;  %v2632_v43 = vmul.f32 1.442695, %v2626_v38  ;;  %v4203_v19 = vunpack.i.h.bf16 %v4201_v39  ;;  %v4202_v21 = vunpack.i.l.bf16 %v4201_v39 }
0x1518   : > { %v4198_v22 = vunpack.i.h.bf16 %v4196_v40  ;;  %v4197_v12 = vunpack.i.l.bf16 %v4196_v40  ;;  %v2812_v40 = vld [vmem:[%s5624_s30 + $0x10] sm:$0xff] }
0x1519   : > { %4256 = vpow2.f32 %v2634_v41  ;;  %v3935_v46 = vpack.c.bf16 %v4203_v19, %v4202_v21  ;;  %v2813_v41 = vld [vmem:[%s5624_s30 + $0x18] sm:$0xff] }
0x151a   : > { %4258 = vpow2.f32 %v2632_v43  ;;  %v3931_v45 = vpack.c.bf16 %v4198_v22, %v4197_v12  ;;  %v3951_v43 = vpack.c.bf16 %v2813_v41, %v2812_v40 }
0x151c   : > { %3932 = vmatprep.subr.bf16.mxu0 %v3931_v45 }
0x151d   : > { %3934 = vmatpush3.bf16.msra.mxu0 %v3931_v45 }
0x151e   : > { %v4253_v47 = vpop.eup %4252  ;;  %3936 = vmatprep.subr.bf16.mxu0 %v3935_v46 }
0x151f   : > { %v4255_v48 = vpop.eup %4254  ;;  %v2637_v49 = vsel %vm947_vm9, %v4253_v47, 0.0 }
0x1520   : > { %v2643_v50 = vsel %vm1349_vm10, %v2637_v49, 0.0  ;;  %v2636_v51 = vsel %vm946_vm11, %v4255_v48, 0.0 }
0x1521   : > { %3938 = vmatpush3.bf16.msra.mxu0 %v3935_v46  ;;  %2644 = vadd.xlane.f32.xlu1 %v2643_v50  ;;  %v2640_v54 = vsel %vm1349_vm10, %v2636_v51, 0.0 }
0x1522   : > { %2641 = vadd.xlane.f32.xlu0 %v2640_v54 }
0x1523   : > { %v4257_v55 = vpop.eup %4256 }
0x1524   : > { %v4259_v56 = vpop.eup %4258  ;;  %v2639_v60 = vsel %vm949_vm12, %v4257_v55, 0.0 }
0x1525   : > { %v2649_v61 = vsel %vm1349_vm10, %v2639_v60, 0.0  ;;  %v2638_v52 = vsel %vm948_vm13, %v4259_v56, 0.0 }
0x1526   : > { %2650 = vadd.xlane.f32.xlu1 %v2649_v61  ;;  %v2646_v62 = vsel %vm1349_vm10, %v2638_v52, 0.0 }
0x1527   : > { %2647 = vadd.xlane.f32.xlu0 %v2646_v62 }
0x1537   : > { %4205 = vrot.lane.b32.xlu1 %v5396_v28, %s4601_s19 }
0x153d   : > { %4210 = vrot.lane.b32.xlu0 %v5400_v58, %s4601_s19  ;;  %s3329_s19 = sshll.u32 %s5635_s26, 3 }
0x153e   : > { %s842_s27 = scalar_lea.vmem %s5623_s9, %s3329_s19  ;;  %s846_s18 = scalar_lea.vmem %s5627_s5, %s3329_s19 }
0x153f   : > { %v2896_v24 = vld [vmem:[%s842_s27] sm:$0xff]  ;;  %s5629_s27 = sld [smem:[#allocation38_spill]] }
0x1540   : > { %v2898_v26 = vsel %vm2897_vm14, %v2896_v24, 0.0 }
0x1541   : > { %v2899_v27 = vrot.slane %v2898_v26, 4 }
0x1543   : > { %v2900_v29 = vadd.f32 %v2899_v27, %v2898_v26 }
0x1545   : > { %v2901_v30 = vrot.slane %v2900_v29, 2  ;;  %s849_s17 = scalar_lea.vmem %s5629_s27, %s5635_s26 }
0x1547   : > { %v2902_v33 = vadd.f32 %v2901_v30, %v2900_v29 }
0x1549   : > { %v2903_v25 = vrot.slane %v2902_v33, 1 }
0x154b   : > { %v2904_v39 = vadd.f32 %v2903_v25, %v2902_v33 }
0x15ae   : > { %v2645_v53 = vpop.xlane.xlu1 %2644 }
0x15af   : > { %vm2653_vm9 = vcmp.gt.f32.partialorder %v2645_v53, 0.0  ;;  %v2642_v63 = vpop.xlane.xlu0 %2641 }
0x15b0   : > { %vm2652_vm11 = vcmp.gt.f32.partialorder %v2642_v63, 0.0  ;;  %v2657_v0 = vsel %vm2653_vm9, %v2645_v53, 1.0 }
0x15b1   : > { %v2656_v57 = vsel %vm2652_vm11, %v2642_v63, 1.0 }
0x15b2   : > { %4260 = vrcp.f32 %v2656_v57 }
0x15b3   : > { %v2651_v3 = vpop.xlane.xlu1 %2650  ;;  %4262 = vrcp.f32 %v2657_v0 }
0x15b4   : > { %vm2655_vm12 = vcmp.gt.f32.partialorder %v2651_v3, 0.0  ;;  %v2648_v59 = vpop.xlane.xlu0 %2647 }
0x15b5   : > { %vm2654_vm13 = vcmp.gt.f32.partialorder %v2648_v59, 0.0  ;;  %v2659_v37 = vsel %vm2655_vm12, %v2651_v3, 1.0 }
0x15b6   : > { %v2658_v5 = vsel %vm2654_vm13, %v2648_v59, 1.0  ;;  %v3005_v59 = vld [vmem:[%s5626_s16 + $0x8] sm:$0xff] }
0x15b7   : > { %4264 = vrcp.f32 %v2658_v5  ;;  %v4206_v6 = vpop.permute.xlu1 %4205  ;;  %v3006_v5 = vld [vmem:[%s5626_s16 + $0x10] sm:$0xff] }
0x15b8   : > { %v4208_v28 = vunpack.i.h.bf16 %v4206_v6  ;;  %v4207_v44 = vunpack.i.l.bf16 %v4206_v6  ;;  %v4211_v7 = vpop.permute.xlu0 %4210  ;;  %4266 = vrcp.f32 %v2659_v37  ;;  %v3007_v6 = vld [vmem:[%s5626_s16 + $0x18] sm:$0xff] }
0x15b9   : > { %v4213_v58 = vunpack.i.h.bf16 %v4211_v7  ;;  %v4212_v36 = vunpack.i.l.bf16 %v4211_v7 }
0x15ba   : > { %v3939_v8 = vpack.c.bf16 %v4208_v28, %v4207_v44  ;;  %v3963_v28 = vpack.c.bf16 %v3007_v6, %v3006_v5  ;;  %v3417_v44 = vld [vmem:[#allocation17] ss:$0 sm:$0xff] }
0x15bb   : > { %v3943_v10 = vpack.c.bf16 %v4213_v58, %v4212_v36  ;;  %v2929_v36 = vld [vmem:[%s5628_s23] sm:$0x1] }
0x15bc   : > { %v4261_v9 = vpop.eup %4260  ;;  %3940 = vmatprep.subr.bf16.mxu0 %v3939_v8 }
0x15bd   : > { %3942 = vmatpush3.bf16.msra.mxu0 %v3939_v8  ;;  %v2664_v11 = vmul.f32 %v4261_v9, %v2636_v51  ;;  %v4263_v14 = vpop.eup %4262 }
0x15be   : > { %3944 = vmatprep.subr.bf16.mxu0 %v3943_v10  ;;  %v2665_v4 = vmul.f32 %v4263_v14, %v2637_v49  ;;  %v3008_v14 = vld [vmem:[#allocation3] sm:$0x1] }
0x15bf   : > { %3754 = vmatprep.mubr.msk.f32.mxu0 %vm1349_vm10, %v2664_v11 }
0x15c1   : > { %v4265_v15 = vpop.eup %4264  ;;  %3946 = vmatpush3.bf16.msra.mxu0 %v3943_v10 }
0x15c2   : > { %3947 = vmatprep.subr.bf16.mxu0 %v4597_v1  ;;  %v4267_v16 = vpop.eup %4266  ;;  %v2666_v17 = vmul.f32 %v4265_v15, %v2638_v52 }
0x15c3   : > { %v2667_v18 = vmul.f32 %v4267_v16, %v2639_v60 }
0x15c4   : > { %3755 = vmatmul.mubr.msk.f32.vlgmr.msra.gmra.mrb[20].mxu0 %vm1349_vm10, %v2665_v4 }
0x15c5   : > { %3757 = vmatprep.mubr.msk.f32.mxu0 %vm1349_vm10, %v2666_v17  ;;  %3949 = vmatpush3.bf16.msra.mxu0 %v3948_v32 }
0x15c6   : > { %3950 = vmatprep.subr.bf16.mxu0 %v4597_v1 }
0x15c8   : > { %3758 = vmatmul.mubr.msk.f32.gmra.mrb[22].mxu0 %vm1349_vm10, %v2667_v18 }
0x15c9   : > { %3768 = vmatprep.mubr.msk.f32.mxu0 %vm4598_vm0, %v4599_v2  ;;  %3952 = vmatpush3.bf16.msra.mxu0 %v3951_v43 }
0x15ca   : > { %3953 = vmatprep.subr.bf16.mxu0 %v4597_v1 }
0x1697   : > { %v3756_v34 = vpop.f32.mrb[20].mxu0 }
0x1698   : > { %2791 = vrot.lane.b32.xlu1 %v3756_v34, %s4605_s3  ;;  %v2770_v13 = vpop.f32.mrb[21].mxu0 }
0x1699   : > { %2789 = vst.msk [vmem:[#allocation2] sm:$0xff] %vm1130_vm7, %v2770_v13  ;;  %vm3083_vm7 = vcmask 0  }
0x169b   : > { %v3759_v35 = vpop.f32.mrb[22].mxu0 }
0x169c   : > { %2801 = vrot.lane.b32.xlu1 %v3759_v35, %s4606_s20  ;;  %v2780_v38 = vpop.f32.mrb[23].mxu0 }
0x169d   : > { %2796 = vrot.lane.b32.xlu0 %v2780_v38, %s4607_s21  ;;  %s5625_s21 = sld [smem:[#allocation34_spill]] }
0x16a0   : > { %2920 = vperm.xlu1 %4215, %v2904_v39  }
0x16a1   : > { %2907 = vperm.xlu0 %4214, %v2896_v24  }
0x16a3   : > { %v2925_v45 = vld [vmem:[%s5625_s21] sm:$0xff]  ;;  %v2927_v51 = vld [vmem:[%s5625_s21 + $0x10] sm:$0xff]  ;;  %v2928_v54 = vld [vmem:[%s5625_s21 + $0x18] sm:$0xff] }
0x16a4   : > { %2806 = vrot.lane.b32.xlu1 %v5375_v42, %s4608_s29  ;;  %v2926_v42 = vld [vmem:[%s5625_s21 + $0x8] sm:$0xff]  ;;  %v3957_v56 = vpack.c.bf16 %v2928_v54, %v2927_v51 }
0x16a5   : > { %v3954_v49 = vpack.c.bf16 %v2926_v42, %v2925_v45 }
0x170a   : > { %v2792_v19 = vpop.permute.xlu1 %2791 }
0x170b   : > { %2794 = vst.msk [vmem:[#allocation2] sm:$0xff] %vm1540_vm1, %v2792_v19 }
0x170e   : > { %v2802_v22 = vpop.permute.xlu1 %2801 }
0x170f   : > { %v2797_v21 = vpop.permute.xlu0 %2796 }
0x1710   : > { %2799 = vst.msk [vmem:[#allocation2] sm:$0xff] %vm1546_vm2, %v2797_v21 }
0x1711   : > { %2804 = vst.msk [vmem:[#allocation2] sm:$0xff] %vm1552_vm3, %v2802_v22 }
0x1718   : > { %v2805_v47 = vld [vmem:[#allocation2] sm:$0xff] }
0x171f   : > { %v2921_v12 = vpop.permute.xlu1 %2920 }
0x1720   : > { %v2908_v48 = vpop.permute.xlu0 %2907  ;;  %4268 = vrcp.f32 %v2921_v12 }
0x1723   : > { %v2807_v46 = vpop.permute.xlu1 %2806 }
0x1724   : > { %v2809_v50 = vadd.f32 %v2807_v46, %v2805_v47 }
0x1726   : > { %v2910_v55 = vmul.f32 %v2908_v48, %v2809_v50  ;;  %3769 = vmatmul.mubr.msk.f32.vlgmr.msra.gmra.mrb[24].mxu0 %vm961_vm5, %v2809_v50 }
0x1727   : > { %3955 = vmatpush3.bf16.msra.mxu0 %v3954_v49  ;;  %3779 = vmatprep.mubr.msk.f32.mxu0 %vm4598_vm0, %v4599_v2  ;;  %v3004_v2 = vld [vmem:[%s5626_s16] sm:$0xff]  ;;  %vm2894_vm0 = vcmask 15360  }
0x1728   : > { %v2911_v60 = vsel %vm961_vm5, %v2910_v55, 0.0  ;;  %3956 = vmatprep.subr.bf16.mxu0 %v4597_v1  ;;  %v3960_v37 = vpack.c.bf16 %v3005_v59, %v3004_v2 }
0x1729   : > { %v2912_v61 = vrot.slane %v2911_v60, 4 }
0x172a   : > { %v4269_v0 = vpop.eup %4268  ;;  %3961 = vmatpush3.bf16.msra.mxu1 %v3960_v37 }
0x172b   : > { %v2913_v52 = vadd.f32 %v2912_v61, %v2911_v60  ;;  %3958 = vmatpush3.bf16.msra.mxu0 %v3957_v56  ;;  %3962 = vmatprep.subr.bf16.mxu1 %v4597_v1 }
0x172d   : > { %v2914_v62 = vrot.slane %v2913_v52, 2 }
0x172e   : > { %3964 = vmatpush3.bf16.msra.mxu1 %v3963_v28 }
0x172f   : > { %v2915_v53 = vadd.f32 %v2914_v62, %v2913_v52 }
0x1731   : > { %v2916_v63 = vrot.slane %v2915_v53, 1 }
0x1733   : > { %v2917_v57 = vadd.f32 %v2916_v63, %v2915_v53 }
0x1735   : > { %v2924_v3 = vmul.f32 %v4269_v0, %v2917_v57 }
0x1737   : > { %3780 = vmatmul.mubr.msk.f32.vlgmr.msra.gmra.mrb[26].mxu0 %vm961_vm5, %v2924_v3 }
0x17f9   : > { %v2890_v7 = vpop.f32.mrb[24].mxu0 }
0x17fa   : > { %v2891_v1 = vadd.f32 %v3417_v44, %v2890_v7  ;;  %v3770_v58 = vpop.f32.mrb[25].mxu0 }
0x17fc   : > { %2895 = vst.msk [vmem:[%s846_s18] sm:$0xff] %vm2894_vm0, %v2891_v1 }
0x180a   : > { %v2999_v8 = vpop.f32.mrb[26].mxu0 }
0x180b   : > { %v3000_v9 = vadd.f32 %v2999_v8, %v2929_v36  ;;  %v3781_v10 = vpop.f32.mrb[27].mxu0 }
0x180d   : > { %v3003_v11 = vmax.f32 %v3000_v9, 0.0 }
0x180f   : > { %3791 = vmatmul.mubr.msk.f32.vlgmr.msra.gmra.mrb[14].mxu1 %vm961_vm5, %v3003_v11 }
0x18e2   : > { %v3078_v15 = vpop.f32.mrb[14].mxu1 }
0x18e3   : > { %v3079_v4 = vadd.f32 %v3078_v15, %v3008_v14  ;;  %v3792_v16 = vpop.f32.mrb[15].mxu1 }
0x18e5   : > { %4270 = vtanh.f32 %v3079_v4 }
0x18ef   : > { %v4271_v17 = vpop.eup %4270 }
0x18f0   : > { %3084 = vst.msk [vmem:[%s849_s17] sm:$0x1] %vm3083_vm7, %v4271_v17 }
0x18f1 PF: > { %p39_p3 = scmp.ge.s32.totalorder %s4927_s28, 6   ;;  %s5630_s23 = smov %s4574_s24 }
0x18f2   : > { %s5631_s24 = smov %s4578_s2  ;;  %s5632_s2 = smov %s4938_s6 }
0x18f3   : > { %s5633_s25 = smov %s4927_s28  ;;  %41 = sbr.rel (!%p39_p3) target bundleno = 24 (0x18), region = 208 }
0x18fa   :  { %3116 = vsyncpa [#allocation5], 1 }
0x18fb   :  { %3118 = vsyncpa [#allocation5 + $0x1], 1 }
0x18fc   :  { %3119 = vsyncpa [#allocation7], 1 }
0x18fd   :  { %3121 = vsyncpa [#allocation7 + $0x1], 1 }
0x18fe   :  { %3122 = vsyncpa [#allocation10], 1 }
0x18ff   :  { %3123 = vsyncpa [#allocation13], 1 }
0x1900   :  { %3124 = vsyncpa [#allocation16], 1 }

</bundles_post_ra>
